<compile_context>
chip_gen: v7x
topology: tpu7x:2x2x1
jax: 0.10.0
libtpu: 0.0.40
codegen_flags: <defaults>
</compile_context>

<pallas_src>
import jax
import jax.numpy as jnp
from jax import lax
from jax.experimental import pallas as pl
from jax.experimental.pallas import tpu as pltpu


def fair_combined_kernel(x_ref, news_ref, w_ih_ref, w_hh_ref, b_ref,
                         w_np_ref, b_np_ref, w1_ts_ref, w1_news_ref,
                         b1_ref, w2_ref, b2_ref, out_ref,
                         gp_ref, h_ref, c_ref):
    t_chunk = x_ref.shape[0]          # x block is (t_chunk, block_b, D), bf16
    H = w_hh_ref.shape[0]
    t_blk = pl.program_id(1)
    n_t = pl.num_programs(1)

    # ---- carried LSTM state: init at the first time chunk of each batch blk
    @pl.when(t_blk == 0)
    def _():
        h_ref[...] = jnp.zeros_like(h_ref)
        c_ref[...] = jnp.zeros_like(c_ref)

    # ---- hoisted input projection for this chunk (off the recurrent path) ----
    # t_chunk independent (block_b, D) @ (D, 4H) MXU matmuls, bf16 in / f32 acc,
    # written time-major so per-step reads below are contiguous.
    for tt in range(t_chunk):
        gp_ref[tt] = (jnp.dot(x_ref[tt], w_ih_ref[...],
                              preferred_element_type=jnp.float32)
                      + b_ref[...])

    # ---- serial recurrence over this chunk ----
    def step(tt, carry):
        h, c = carry
        gates = gp_ref[tt] + jnp.dot(h.astype(jnp.bfloat16), w_hh_ref[...],
                                     preferred_element_type=jnp.float32)
        # gate columns were permuted to [i, f, o, g] at param-prep time:
        sig = jax.nn.sigmoid(gates[:, :3 * H])      # one EUP pass for i|f|o
        i_g = sig[:, :H]
        f_g = sig[:, H:2 * H]
        o_g = sig[:, 2 * H:]
        g_g = jnp.tanh(gates[:, 3 * H:])
        c_new = f_g * c + i_g * g_g
        h_new = o_g * jnp.tanh(c_new)
        return h_new, c_new

    h, c = lax.fori_loop(0, t_chunk, step, (h_ref[...], c_ref[...]),
                         unroll=True)
    h_ref[...] = h
    c_ref[...] = c

    # ---- news branch + regressor: only on the last time chunk ----
    @pl.when(t_blk == n_t - 1)
    def _():
        news_ctx = (jnp.dot(news_ref[...], w_np_ref[...],
                            preferred_element_type=jnp.float32)
                    + b_np_ref[...])
        # concat([h, news_ctx], 1) @ W1  ==  h @ W1[:H] + news_ctx @ W1[H:]
        z = (jnp.dot(h.astype(jnp.bfloat16), w1_ts_ref[...],
                     preferred_element_type=jnp.float32)
             + jnp.dot(news_ctx.astype(jnp.bfloat16), w1_news_ref[...],
                       preferred_element_type=jnp.float32)
             + b1_ref[...])
        z = jnp.maximum(z, 0.0)
        # W2 is padded to 128 output lanes (col 0 real) -> full unmasked store.
        y = (jnp.dot(z.astype(jnp.bfloat16), w2_ref[...],
                     preferred_element_type=jnp.float32) + b2_ref[...])
        out_ref[...] = y


def fair_combined_forward(ts_x, news_x, params, t_chunk=None):
    """ts_x: (B, T, D) batch-first f32; news_x: (B, E) f32. Returns (B, 1)."""
    B, T, D = ts_x.shape
    E = news_x.shape[1]
    H = params["w_hh"].shape[0]

    kind = jax.devices()[0].device_kind.lower()
    # v5e MXU is 4x128x128 -> 128 rows fill it; v6e/v7x are 2x256x256 -> 256.
    max_bb = 128 if "v5" in kind else 256
    # Explicit scoped VMEM limit: generous on v5e/v6e (128 MiB physical),
    # conservative headroom on v7x (64 MiB physical).
    vmem_limit = (100 << 20) if ("v5" in kind or "v6" in kind) else (48 << 20)

    if B <= max_bb:
        block_b, b_pad = B, B
    else:
        block_b = max_bb
        b_pad = ((B + block_b - 1) // block_b) * block_b

    if t_chunk is None:
        t_chunk = next(d for d in range(min(T, 32), 0, -1) if T % d == 0)
    assert T % t_chunk == 0, "t_chunk must divide T"

    # Time-major, bf16 MXU feed. (transpose + cast is one cheap XLA pass of x)
    x_tbd = jnp.transpose(ts_x, (1, 0, 2)).astype(jnp.bfloat16)   # (T, B, D)
    news = news_x.astype(jnp.bfloat16)
    if b_pad != B:
        x_tbd = jnp.pad(x_tbd, ((0, 0), (0, b_pad - B), (0, 0)))
        news = jnp.pad(news, ((0, b_pad - B), (0, 0)))

    grid = (b_pad // block_b, T // t_chunk)

    def xmap(i, t):
        return (t, i, 0)

    def bmap(i, t):
        return (i, 0)

    def wmap(i, t):
        return (0, 0)

    in_specs = [
        pl.BlockSpec((t_chunk, block_b, D), xmap),   # x, time-major
        pl.BlockSpec((block_b, E), bmap),            # news
        pl.BlockSpec((D, 4 * H), wmap),              # w_ih (bf16, [i,f,o,g])
        pl.BlockSpec((H, 4 * H), wmap),              # w_hh (bf16, [i,f,o,g])
        pl.BlockSpec((1, 4 * H), wmap),              # b_ih + b_hh (f32)
        pl.BlockSpec((E, H), wmap),                  # news_proj weight^T (bf16)
        pl.BlockSpec((1, H), wmap),                  # news_proj bias (f32)
        pl.BlockSpec((H, 32), wmap),                 # W1 ts half (bf16)
        pl.BlockSpec((H, 32), wmap),                 # W1 news half (bf16)
        pl.BlockSpec((1, 32), wmap),                 # b1 (f32)
        pl.BlockSpec((32, 128), wmap),               # W2 padded to 128 (bf16)
        pl.BlockSpec((1, 128), wmap),                # b2 padded to 128 (f32)
    ]

    out = pl.pallas_call(
        fair_combined_kernel,
        out_shape=jax.ShapeDtypeStruct((b_pad, 128), jnp.float32),
        grid=grid,
        in_specs=in_specs,
        out_specs=pl.BlockSpec((block_b, 128), bmap),
        scratch_shapes=[
            pltpu.VMEM((t_chunk, block_b, 4 * H), jnp.float32),  # gates-pre
            pltpu.VMEM((block_b, H), jnp.float32),               # h (carried)
            pltpu.VMEM((block_b, H), jnp.float32),               # c (carried)
        ],
        compiler_params=pltpu.CompilerParams(
            dimension_semantics=("parallel", "arbitrary"),
            vmem_limit_bytes=vmem_limit),
    )(x_tbd, news,
      params["w_ih"], params["w_hh"], params["b"],
      params["w_np"], params["b_np"],
      params["w1_ts"], params["w1_news"], params["b1"],
      params["w2"], params["b2"])

    return out[:B, :1]


def make_params(key, ts_input_size, embedding_size, hidden_size):
    """PyTorch-style init, stored pre-transposed / permuted / bf16 for the kernel."""
    H, D, E = hidden_size, ts_input_size, embedding_size
    ks = jax.random.split(key, 10)

    def u(k, shape, s):
        return jax.random.uniform(k, shape, jnp.float32, -s, s)

    s_lstm = 1.0 / jnp.sqrt(H)
    # PyTorch LSTM layout: gate rows in order [i; f; g; o], each H rows.
    w_ih_pt = u(ks[0], (4 * H, D), s_lstm)     # torch weight_ih_l0
    w_hh_pt = u(ks[1], (4 * H, H), s_lstm)     # torch weight_hh_l0
    b_ih = u(ks[2], (4 * H,), s_lstm)
    b_hh = u(ks[3], (4 * H,), s_lstm)

    # Permute gate blocks [i, f, g, o] -> [i, f, o, g]: one sigmoid over the
    # first 3H columns + one tanh over the last H inside the kernel.
    perm = jnp.concatenate([jnp.arange(0, H), jnp.arange(H, 2 * H),
                            jnp.arange(3 * H, 4 * H), jnp.arange(2 * H, 3 * H)])
    w_ih_pt = w_ih_pt[perm]
    w_hh_pt = w_hh_pt[perm]
    b = (b_ih + b_hh)[perm]

    s_np = 1.0 / jnp.sqrt(E)
    w_np_pt = u(ks[4], (H, E), s_np)           # news_proj.weight
    b_np = u(ks[5], (H,), s_np)

    s1 = 1.0 / jnp.sqrt(2 * H)
    w1_pt = u(ks[6], (32, 2 * H), s1)          # regressor[0].weight
    b1 = u(ks[7], (32,), s1)
    s2 = 1.0 / jnp.sqrt(32.0)
    w2_pt = u(ks[8], (1, 32), s2)              # regressor[2].weight
    b2 = u(ks[9], (1,), s2)

    w1_t = w1_pt.T                              # (2H, 32)
    # Pad the final projection to 128 output lanes (col 0 real, rest zero) so
    # the kernel's output store is a full, unmasked (block_b, 128) lane tile.
    w2_pad = jnp.zeros((32, 128), jnp.float32).at[:, 0].set(w2_pt[0])
    b2_pad = jnp.zeros((1, 128), jnp.float32).at[0, 0].set(b2[0])

    bf16 = jnp.bfloat16
    return {
        "w_ih": w_ih_pt.T.astype(bf16),         # (D, 4H) cols [i,f,o,g]
        "w_hh": w_hh_pt.T.astype(bf16),         # (H, 4H) cols [i,f,o,g]
        "b": b[None, :],                        # (1, 4H) f32
        "w_np": w_np_pt.T.astype(bf16),         # (E, H)
        "b_np": b_np[None, :],                  # (1, H) f32
        "w1_ts": w1_t[:H].astype(bf16),         # (H, 32) ts_context half
        "w1_news": w1_t[H:].astype(bf16),       # (H, 32) news_context half
        "b1": b1[None, :],                      # (1, 32) f32
        "w2": w2_pad.astype(bf16),              # (32, 128) padded
        "b2": b2_pad,                           # (1, 128) f32 padded
    }


def reference_forward(ts_x, news_x, params):
    """Pure-JAX reference mirroring the PyTorch module (and kernel bf16 casts)."""
    B, T, D = ts_x.shape
    H = params["w_hh"].shape[0]
    bf16 = jnp.bfloat16
    x_bf = jnp.transpose(ts_x, (1, 0, 2)).astype(bf16)   # (T, B, D)

    def step(carry, x_t):
        h, c = carry
        gates = (jnp.dot(x_t, params["w_ih"], preferred_element_type=jnp.float32)
                 + jnp.dot(h.astype(bf16), params["w_hh"],
                           preferred_element_type=jnp.float32)
                 + params["b"])
        i_g = jax.nn.sigmoid(gates[:, 0 * H:1 * H])
        f_g = jax.nn.sigmoid(gates[:, 1 * H:2 * H])
        o_g = jax.nn.sigmoid(gates[:, 2 * H:3 * H])
        g_g = jnp.tanh(gates[:, 3 * H:4 * H])
        c_new = f_g * c + i_g * g_g
        h_new = o_g * jnp.tanh(c_new)
        return (h_new, c_new), None

    h0 = jnp.zeros((B, H), jnp.float32)
    c0 = jnp.zeros((B, H), jnp.float32)
    (hT, _), _ = lax.scan(step, (h0, c0), x_bf)
    news_ctx = (jnp.dot(news_x.astype(bf16), params["w_np"],
                        preferred_element_type=jnp.float32) + params["b_np"])
    z = jnp.maximum(
        jnp.dot(hT.astype(bf16), params["w1_ts"],
                preferred_element_type=jnp.float32)
        + jnp.dot(news_ctx.astype(bf16), params["w1_news"],
                  preferred_element_type=jnp.float32)
        + params["b1"], 0.0)
    y = (jnp.dot(z.astype(bf16), params["w2"],
                 preferred_element_type=jnp.float32) + params["b2"])
    return y[:, :1]


if __name__ == "__main__":
    # batch=2, seq=8, ts_input_size=16, embedding_size=32, hidden_size=64
    B, T, D, E, H = 2, 8, 16, 32, 64
    key = jax.random.PRNGKey(0)
    k_ts, k_news, k_p = jax.random.split(key, 3)
    ts_x = jax.random.normal(k_ts, (B, T, D), jnp.float32)
    news_x = jax.random.normal(k_news, (B, E), jnp.float32)
    params = make_params(k_p, ts_input_size=D, embedding_size=E, hidden_size=H)

    # t_chunk=4 -> grid (1, 2): exercises the carried-h/c init/finalize path.
    out = fair_combined_forward(ts_x, news_x, params, t_chunk=4)
    out = jax.block_until_ready(out)

    ref = reference_forward(ts_x, news_x, params)
    assert out.shape == (B, 1)
    assert jnp.allclose(out, ref, atol=2e-3, rtol=2e-3), (out, ref)
    print("KERNEL_OK")
</pallas_src>

<mosaic_0001>
module attributes {stable_mosaic.version = 11 : i64} {
  func.func @fair_combined_kernel(%arg0: i32, %arg1: i32, %arg2: memref<4x2x16xbf16, #tpu.memory_space<vmem>>, %arg3: memref<2x32xbf16, #tpu.memory_space<vmem>>, %arg4: memref<16x256xbf16, #tpu.memory_space<vmem>>, %arg5: memref<64x256xbf16, #tpu.memory_space<vmem>>, %arg6: memref<1x256xf32, #tpu.memory_space<vmem>>, %arg7: memref<32x64xbf16, #tpu.memory_space<vmem>>, %arg8: memref<1x64xf32, #tpu.memory_space<vmem>>, %arg9: memref<64x32xbf16, #tpu.memory_space<vmem>>, %arg10: memref<64x32xbf16, #tpu.memory_space<vmem>>, %arg11: memref<1x32xf32, #tpu.memory_space<vmem>>, %arg12: memref<32x128xbf16, #tpu.memory_space<vmem>>, %arg13: memref<1x128xf32, #tpu.memory_space<vmem>>, %arg14: memref<2x128xf32, #tpu.memory_space<vmem>>, %arg15: memref<4x2x256xf32, #tpu.memory_space<vmem>>, %arg16: memref<2x64xf32, #tpu.memory_space<vmem>>, %arg17: memref<2x64xf32, #tpu.memory_space<vmem>>) attributes {dimension_semantics = [#tpu.dimension_semantics<parallel>, #tpu.dimension_semantics<arbitrary>], iteration_bounds = array<i64: 1, 2>, scalar_prefetch = 0 : i64, scratch_operands = 3 : i64, tpu.core_type = #tpu.core_type<tc>, window_params = [{transform_indices = @transform_0, window_bounds = array<i64: 4, 2, 16>}, {transform_indices = @transform_1, window_bounds = array<i64: 2, 32>}, {pipeline_mode = #tpu.pipeline_mode<synchronous>, transform_indices = @transform_2, window_bounds = array<i64: 16, 256>}, {pipeline_mode = #tpu.pipeline_mode<synchronous>, transform_indices = @transform_3, window_bounds = array<i64: 64, 256>}, {pipeline_mode = #tpu.pipeline_mode<synchronous>, transform_indices = @transform_4, window_bounds = array<i64: 1, 256>}, {pipeline_mode = #tpu.pipeline_mode<synchronous>, transform_indices = @transform_5, window_bounds = array<i64: 32, 64>}, {pipeline_mode = #tpu.pipeline_mode<synchronous>, transform_indices = @transform_6, window_bounds = array<i64: 1, 64>}, {pipeline_mode = #tpu.pipeline_mode<synchronous>, transform_indices = @transform_7, window_bounds = array<i64: 64, 32>}, {pipeline_mode = #tpu.pipeline_mode<synchronous>, transform_indices = @transform_8, window_bounds = array<i64: 64, 32>}, {pipeline_mode = #tpu.pipeline_mode<synchronous>, transform_indices = @transform_9, window_bounds = array<i64: 1, 32>}, {pipeline_mode = #tpu.pipeline_mode<synchronous>, transform_indices = @transform_10, window_bounds = array<i64: 32, 128>}, {pipeline_mode = #tpu.pipeline_mode<synchronous>, transform_indices = @transform_11, window_bounds = array<i64: 1, 128>}, {transform_indices = @transform_12, window_bounds = array<i64: 2, 128>}]} {
    %c0_i32 = arith.constant 0 : i32
    %0 = arith.cmpi eq, %arg1, %c0_i32 : i32
    %1 = arith.extui %0 : i1 to i32
    %c0_i32_0 = arith.constant 0 : i32
    %2 = arith.cmpi ne, %1, %c0_i32_0 : i32
    scf.if %2 {
      %cst_75 = arith.constant 0.000000e+00 : f32
      %142 = vector.broadcast %cst_75 : f32 to vector<2x64xf32>
      %c0_76 = arith.constant 0 : index
      %c0_77 = arith.constant 0 : index
      %143 = vector.load %arg16[%c0_76, %c0_77] : memref<2x64xf32, #tpu.memory_space<vmem>>, vector<2x64xf32>
      tpu.vector_store %arg16[%c0_76, %c0_77], %142 {strides = array<i32>} : memref<2x64xf32, #tpu.memory_space<vmem>>, vector<2x64xf32>,
      %cst_78 = arith.constant 0.000000e+00 : f32
      %144 = vector.broadcast %cst_78 : f32 to vector<2x64xf32>
      %c0_79 = arith.constant 0 : index
      %c0_80 = arith.constant 0 : index
      %145 = vector.load %arg17[%c0_79, %c0_80] : memref<2x64xf32, #tpu.memory_space<vmem>>, vector<2x64xf32>
      tpu.vector_store %arg17[%c0_79, %c0_80], %144 {strides = array<i32>} : memref<2x64xf32, #tpu.memory_space<vmem>>, vector<2x64xf32>,
    } else {
    }
    %c0 = arith.constant 0 : index
    %c0_1 = arith.constant 0 : index
    %c0_2 = arith.constant 0 : index
    %3 = vector.load %arg2[%c0, %c0_1, %c0_2] : memref<4x2x16xbf16, #tpu.memory_space<vmem>>, vector<1x2x16xbf16>
    %4 = vector.shape_cast %3 : vector<1x2x16xbf16> to vector<2x16xbf16>
    %c0_3 = arith.constant 0 : index
    %c0_4 = arith.constant 0 : index
    %5 = vector.load %arg4[%c0_3, %c0_4] : memref<16x256xbf16, #tpu.memory_space<vmem>>, vector<16x256xbf16>
    %cst = arith.constant dense<0.000000e+00> : vector<2x256xf32>
    %6 = tpu.matmul %4, %5, %cst {dimension_numbers = #tpu.dot_dimension_numbers<[1], [0], [0], [1], [0, 0, 1, 1], [], []>} : vector<2x16xbf16>, vector<16x256xbf16>, vector<2x256xf32> -> vector<2x256xf32>
    %c0_5 = arith.constant 0 : index
    %c0_6 = arith.constant 0 : index
    %7 = vector.load %arg6[%c0_5, %c0_6] : memref<1x256xf32, #tpu.memory_space<vmem>>, vector<1x256xf32>
    %8 = vector.broadcast %7 : vector<1x256xf32> to vector<2x256xf32>
    %9 = arith.addf %6, %8 : vector<2x256xf32>
    %c0_7 = arith.constant 0 : index
    %c0_8 = arith.constant 0 : index
    %c0_9 = arith.constant 0 : index
    %10 = vector.load %arg15[%c0_7, %c0_8, %c0_9] : memref<4x2x256xf32, #tpu.memory_space<vmem>>, vector<1x2x256xf32>
    %11 = vector.shape_cast %10 : vector<1x2x256xf32> to vector<2x256xf32>
    %12 = vector.shape_cast %9 : vector<2x256xf32> to vector<1x2x256xf32>
    tpu.vector_store %arg15[%c0_7, %c0_8, %c0_9], %12 {strides = array<i32>} : memref<4x2x256xf32, #tpu.memory_space<vmem>>, vector<1x2x256xf32>,
    %c1 = arith.constant 1 : index
    %c0_10 = arith.constant 0 : index
    %c0_11 = arith.constant 0 : index
    %13 = vector.load %arg2[%c1, %c0_10, %c0_11] : memref<4x2x16xbf16, #tpu.memory_space<vmem>>, vector<1x2x16xbf16>
    %14 = vector.shape_cast %13 : vector<1x2x16xbf16> to vector<2x16xbf16>
    %c0_12 = arith.constant 0 : index
    %c0_13 = arith.constant 0 : index
    %15 = vector.load %arg4[%c0_12, %c0_13] : memref<16x256xbf16, #tpu.memory_space<vmem>>, vector<16x256xbf16>
    %cst_14 = arith.constant dense<0.000000e+00> : vector<2x256xf32>
    %16 = tpu.matmul %14, %15, %cst_14 {dimension_numbers = #tpu.dot_dimension_numbers<[1], [0], [0], [1], [0, 0, 1, 1], [], []>} : vector<2x16xbf16>, vector<16x256xbf16>, vector<2x256xf32> -> vector<2x256xf32>
    %c0_15 = arith.constant 0 : index
    %c0_16 = arith.constant 0 : index
    %17 = vector.load %arg6[%c0_15, %c0_16] : memref<1x256xf32, #tpu.memory_space<vmem>>, vector<1x256xf32>
    %18 = vector.broadcast %17 : vector<1x256xf32> to vector<2x256xf32>
    %19 = arith.addf %16, %18 : vector<2x256xf32>
    %c1_17 = arith.constant 1 : index
    %c0_18 = arith.constant 0 : index
    %c0_19 = arith.constant 0 : index
    %20 = vector.load %arg15[%c1_17, %c0_18, %c0_19] : memref<4x2x256xf32, #tpu.memory_space<vmem>>, vector<1x2x256xf32>
    %21 = vector.shape_cast %20 : vector<1x2x256xf32> to vector<2x256xf32>
    %22 = vector.shape_cast %19 : vector<2x256xf32> to vector<1x2x256xf32>
    tpu.vector_store %arg15[%c1_17, %c0_18, %c0_19], %22 {strides = array<i32>} : memref<4x2x256xf32, #tpu.memory_space<vmem>>, vector<1x2x256xf32>,
    %c2 = arith.constant 2 : index
    %c0_20 = arith.constant 0 : index
    %c0_21 = arith.constant 0 : index
    %23 = vector.load %arg2[%c2, %c0_20, %c0_21] : memref<4x2x16xbf16, #tpu.memory_space<vmem>>, vector<1x2x16xbf16>
    %24 = vector.shape_cast %23 : vector<1x2x16xbf16> to vector<2x16xbf16>
    %c0_22 = arith.constant 0 : index
    %c0_23 = arith.constant 0 : index
    %25 = vector.load %arg4[%c0_22, %c0_23] : memref<16x256xbf16, #tpu.memory_space<vmem>>, vector<16x256xbf16>
    %cst_24 = arith.constant dense<0.000000e+00> : vector<2x256xf32>
    %26 = tpu.matmul %24, %25, %cst_24 {dimension_numbers = #tpu.dot_dimension_numbers<[1], [0], [0], [1], [0, 0, 1, 1], [], []>} : vector<2x16xbf16>, vector<16x256xbf16>, vector<2x256xf32> -> vector<2x256xf32>
    %c0_25 = arith.constant 0 : index
    %c0_26 = arith.constant 0 : index
    %27 = vector.load %arg6[%c0_25, %c0_26] : memref<1x256xf32, #tpu.memory_space<vmem>>, vector<1x256xf32>
    %28 = vector.broadcast %27 : vector<1x256xf32> to vector<2x256xf32>
    %29 = arith.addf %26, %28 : vector<2x256xf32>
    %c2_27 = arith.constant 2 : index
    %c0_28 = arith.constant 0 : index
    %c0_29 = arith.constant 0 : index
    %30 = vector.load %arg15[%c2_27, %c0_28, %c0_29] : memref<4x2x256xf32, #tpu.memory_space<vmem>>, vector<1x2x256xf32>
    %31 = vector.shape_cast %30 : vector<1x2x256xf32> to vector<2x256xf32>
    %32 = vector.shape_cast %29 : vector<2x256xf32> to vector<1x2x256xf32>
    tpu.vector_store %arg15[%c2_27, %c0_28, %c0_29], %32 {strides = array<i32>} : memref<4x2x256xf32, #tpu.memory_space<vmem>>, vector<1x2x256xf32>,
    %c3 = arith.constant 3 : index
    %c0_30 = arith.constant 0 : index
    %c0_31 = arith.constant 0 : index
    %33 = vector.load %arg2[%c3, %c0_30, %c0_31] : memref<4x2x16xbf16, #tpu.memory_space<vmem>>, vector<1x2x16xbf16>
    %34 = vector.shape_cast %33 : vector<1x2x16xbf16> to vector<2x16xbf16>
    %c0_32 = arith.constant 0 : index
    %c0_33 = arith.constant 0 : index
    %35 = vector.load %arg4[%c0_32, %c0_33] : memref<16x256xbf16, #tpu.memory_space<vmem>>, vector<16x256xbf16>
    %cst_34 = arith.constant dense<0.000000e+00> : vector<2x256xf32>
    %36 = tpu.matmul %34, %35, %cst_34 {dimension_numbers = #tpu.dot_dimension_numbers<[1], [0], [0], [1], [0, 0, 1, 1], [], []>} : vector<2x16xbf16>, vector<16x256xbf16>, vector<2x256xf32> -> vector<2x256xf32>
    %c0_35 = arith.constant 0 : index
    %c0_36 = arith.constant 0 : index
    %37 = vector.load %arg6[%c0_35, %c0_36] : memref<1x256xf32, #tpu.memory_space<vmem>>, vector<1x256xf32>
    %38 = vector.broadcast %37 : vector<1x256xf32> to vector<2x256xf32>
    %39 = arith.addf %36, %38 : vector<2x256xf32>
    %c3_37 = arith.constant 3 : index
    %c0_38 = arith.constant 0 : index
    %c0_39 = arith.constant 0 : index
    %40 = vector.load %arg15[%c3_37, %c0_38, %c0_39] : memref<4x2x256xf32, #tpu.memory_space<vmem>>, vector<1x2x256xf32>
    %41 = vector.shape_cast %40 : vector<1x2x256xf32> to vector<2x256xf32>
    %42 = vector.shape_cast %39 : vector<2x256xf32> to vector<1x2x256xf32>
    tpu.vector_store %arg15[%c3_37, %c0_38, %c0_39], %42 {strides = array<i32>} : memref<4x2x256xf32, #tpu.memory_space<vmem>>, vector<1x2x256xf32>,
    %c0_40 = arith.constant 0 : index
    %c0_41 = arith.constant 0 : index
    %43 = vector.load %arg16[%c0_40, %c0_41] : memref<2x64xf32, #tpu.memory_space<vmem>>, vector<2x64xf32>
    %c0_42 = arith.constant 0 : index
    %c0_43 = arith.constant 0 : index
    %44 = vector.load %arg17[%c0_42, %c0_43] : memref<2x64xf32, #tpu.memory_space<vmem>>, vector<2x64xf32>
    %c0_i32_44 = arith.constant 0 : i32
    %45 = arith.index_cast %c0_i32_44 : i32 to index
    %c0_45 = arith.constant 0 : index
    %c0_46 = arith.constant 0 : index
    %46 = vector.load %arg15[%45, %c0_45, %c0_46] : memref<4x2x256xf32, #tpu.memory_space<vmem>>, vector<1x2x256xf32>
    %47 = vector.shape_cast %46 : vector<1x2x256xf32> to vector<2x256xf32>
    %48 = arith.truncf %43 : vector<2x64xf32> to vector<2x64xbf16>
    %c0_47 = arith.constant 0 : index
    %c0_48 = arith.constant 0 : index
    %49 = vector.load %arg5[%c0_47, %c0_48] : memref<64x256xbf16, #tpu.memory_space<vmem>>, vector<64x256xbf16>
    %cst_49 = arith.constant dense<0.000000e+00> : vector<2x256xf32>
    %50 = tpu.matmul %48, %49, %cst_49 {dimension_numbers = #tpu.dot_dimension_numbers<[1], [0], [0], [1], [0, 0, 1, 1], [], []>} : vector<2x64xbf16>, vector<64x256xbf16>, vector<2x256xf32> -> vector<2x256xf32>
    %51 = arith.addf %47, %50 : vector<2x256xf32>
    %52 = vector.extract_strided_slice %51 {offsets = [0, 0], sizes = [2, 192], strides = [1, 1]} : vector<2x256xf32> to vector<2x192xf32>
    %53 = arith.negf %52 : vector<2x192xf32>
    %54 = math.exp %53 : vector<2x192xf32>
    %cst_50 = arith.constant 1.000000e+00 : f32
    %55 = vector.broadcast %cst_50 : f32 to vector<2x192xf32>
    %56 = arith.addf %55, %54 : vector<2x192xf32>
    %57 = arith.divf %55, %56 : vector<2x192xf32>
    %58 = vector.extract_strided_slice %57 {offsets = [0, 0], sizes = [2, 64], strides = [1, 1]} : vector<2x192xf32> to vector<2x64xf32>
    %59 = vector.extract_strided_slice %57 {offsets = [0, 64], sizes = [2, 64], strides = [1, 1]} : vector<2x192xf32> to vector<2x64xf32>
    %60 = vector.extract_strided_slice %57 {offsets = [0, 128], sizes = [2, 64], strides = [1, 1]} : vector<2x192xf32> to vector<2x64xf32>
    %61 = vector.extract_strided_slice %51 {offsets = [0, 192], sizes = [2, 64], strides = [1, 1]} : vector<2x256xf32> to vector<2x64xf32>
    %62 = math.tanh %61 : vector<2x64xf32>
    %63 = arith.mulf %59, %44 : vector<2x64xf32>
    %64 = arith.mulf %58, %62 : vector<2x64xf32>
    %65 = arith.addf %63, %64 : vector<2x64xf32>
    %66 = math.tanh %65 : vector<2x64xf32>
    %67 = arith.mulf %60, %66 : vector<2x64xf32>
    %c1_i32 = arith.constant 1 : i32
    %68 = arith.index_cast %c1_i32 : i32 to index
    %c0_51 = arith.constant 0 : index
    %c0_52 = arith.constant 0 : index
    %69 = vector.load %arg15[%68, %c0_51, %c0_52] : memref<4x2x256xf32, #tpu.memory_space<vmem>>, vector<1x2x256xf32>
    %70 = vector.shape_cast %69 : vector<1x2x256xf32> to vector<2x256xf32>
    %71 = arith.truncf %67 : vector<2x64xf32> to vector<2x64xbf16>
    %c0_53 = arith.constant 0 : index
    %c0_54 = arith.constant 0 : index
    %72 = vector.load %arg5[%c0_53, %c0_54] : memref<64x256xbf16, #tpu.memory_space<vmem>>, vector<64x256xbf16>
    %cst_55 = arith.constant dense<0.000000e+00> : vector<2x256xf32>
    %73 = tpu.matmul %71, %72, %cst_55 {dimension_numbers = #tpu.dot_dimension_numbers<[1], [0], [0], [1], [0, 0, 1, 1], [], []>} : vector<2x64xbf16>, vector<64x256xbf16>, vector<2x256xf32> -> vector<2x256xf32>
    %74 = arith.addf %70, %73 : vector<2x256xf32>
    %75 = vector.extract_strided_slice %74 {offsets = [0, 0], sizes = [2, 192], strides = [1, 1]} : vector<2x256xf32> to vector<2x192xf32>
    %76 = arith.negf %75 : vector<2x192xf32>
    %77 = math.exp %76 : vector<2x192xf32>
    %cst_56 = arith.constant 1.000000e+00 : f32
    %78 = vector.broadcast %cst_56 : f32 to vector<2x192xf32>
    %79 = arith.addf %78, %77 : vector<2x192xf32>
    %80 = arith.divf %78, %79 : vector<2x192xf32>
    %81 = vector.extract_strided_slice %80 {offsets = [0, 0], sizes = [2, 64], strides = [1, 1]} : vector<2x192xf32> to vector<2x64xf32>
    %82 = vector.extract_strided_slice %80 {offsets = [0, 64], sizes = [2, 64], strides = [1, 1]} : vector<2x192xf32> to vector<2x64xf32>
    %83 = vector.extract_strided_slice %80 {offsets = [0, 128], sizes = [2, 64], strides = [1, 1]} : vector<2x192xf32> to vector<2x64xf32>
    %84 = vector.extract_strided_slice %74 {offsets = [0, 192], sizes = [2, 64], strides = [1, 1]} : vector<2x256xf32> to vector<2x64xf32>
    %85 = math.tanh %84 : vector<2x64xf32>
    %86 = arith.mulf %82, %65 : vector<2x64xf32>
    %87 = arith.mulf %81, %85 : vector<2x64xf32>
    %88 = arith.addf %86, %87 : vector<2x64xf32>
    %89 = math.tanh %88 : vector<2x64xf32>
    %90 = arith.mulf %83, %89 : vector<2x64xf32>
    %c2_i32 = arith.constant 2 : i32
    %91 = arith.index_cast %c2_i32 : i32 to index
    %c0_57 = arith.constant 0 : index
    %c0_58 = arith.constant 0 : index
    %92 = vector.load %arg15[%91, %c0_57, %c0_58] : memref<4x2x256xf32, #tpu.memory_space<vmem>>, vector<1x2x256xf32>
    %93 = vector.shape_cast %92 : vector<1x2x256xf32> to vector<2x256xf32>
    %94 = arith.truncf %90 : vector<2x64xf32> to vector<2x64xbf16>
    %c0_59 = arith.constant 0 : index
    %c0_60 = arith.constant 0 : index
    %95 = vector.load %arg5[%c0_59, %c0_60] : memref<64x256xbf16, #tpu.memory_space<vmem>>, vector<64x256xbf16>
    %cst_61 = arith.constant dense<0.000000e+00> : vector<2x256xf32>
    %96 = tpu.matmul %94, %95, %cst_61 {dimension_numbers = #tpu.dot_dimension_numbers<[1], [0], [0], [1], [0, 0, 1, 1], [], []>} : vector<2x64xbf16>, vector<64x256xbf16>, vector<2x256xf32> -> vector<2x256xf32>
    %97 = arith.addf %93, %96 : vector<2x256xf32>
    %98 = vector.extract_strided_slice %97 {offsets = [0, 0], sizes = [2, 192], strides = [1, 1]} : vector<2x256xf32> to vector<2x192xf32>
    %99 = arith.negf %98 : vector<2x192xf32>
    %100 = math.exp %99 : vector<2x192xf32>
    %cst_62 = arith.constant 1.000000e+00 : f32
    %101 = vector.broadcast %cst_62 : f32 to vector<2x192xf32>
    %102 = arith.addf %101, %100 : vector<2x192xf32>
    %103 = arith.divf %101, %102 : vector<2x192xf32>
    %104 = vector.extract_strided_slice %103 {offsets = [0, 0], sizes = [2, 64], strides = [1, 1]} : vector<2x192xf32> to vector<2x64xf32>
    %105 = vector.extract_strided_slice %103 {offsets = [0, 64], sizes = [2, 64], strides = [1, 1]} : vector<2x192xf32> to vector<2x64xf32>
    %106 = vector.extract_strided_slice %103 {offsets = [0, 128], sizes = [2, 64], strides = [1, 1]} : vector<2x192xf32> to vector<2x64xf32>
    %107 = vector.extract_strided_slice %97 {offsets = [0, 192], sizes = [2, 64], strides = [1, 1]} : vector<2x256xf32> to vector<2x64xf32>
    %108 = math.tanh %107 : vector<2x64xf32>
    %109 = arith.mulf %105, %88 : vector<2x64xf32>
    %110 = arith.mulf %104, %108 : vector<2x64xf32>
    %111 = arith.addf %109, %110 : vector<2x64xf32>
    %112 = math.tanh %111 : vector<2x64xf32>
    %113 = arith.mulf %106, %112 : vector<2x64xf32>
    %c3_i32 = arith.constant 3 : i32
    %114 = arith.index_cast %c3_i32 : i32 to index
    %c0_63 = arith.constant 0 : index
    %c0_64 = arith.constant 0 : index
    %115 = vector.load %arg15[%114, %c0_63, %c0_64] : memref<4x2x256xf32, #tpu.memory_space<vmem>>, vector<1x2x256xf32>
    %116 = vector.shape_cast %115 : vector<1x2x256xf32> to vector<2x256xf32>
    %117 = arith.truncf %113 : vector<2x64xf32> to vector<2x64xbf16>
    %c0_65 = arith.constant 0 : index
    %c0_66 = arith.constant 0 : index
    %118 = vector.load %arg5[%c0_65, %c0_66] : memref<64x256xbf16, #tpu.memory_space<vmem>>, vector<64x256xbf16>
    %cst_67 = arith.constant dense<0.000000e+00> : vector<2x256xf32>
    %119 = tpu.matmul %117, %118, %cst_67 {dimension_numbers = #tpu.dot_dimension_numbers<[1], [0], [0], [1], [0, 0, 1, 1], [], []>} : vector<2x64xbf16>, vector<64x256xbf16>, vector<2x256xf32> -> vector<2x256xf32>
    %120 = arith.addf %116, %119 : vector<2x256xf32>
    %121 = vector.extract_strided_slice %120 {offsets = [0, 0], sizes = [2, 192], strides = [1, 1]} : vector<2x256xf32> to vector<2x192xf32>
    %122 = arith.negf %121 : vector<2x192xf32>
    %123 = math.exp %122 : vector<2x192xf32>
    %cst_68 = arith.constant 1.000000e+00 : f32
    %124 = vector.broadcast %cst_68 : f32 to vector<2x192xf32>
    %125 = arith.addf %124, %123 : vector<2x192xf32>
    %126 = arith.divf %124, %125 : vector<2x192xf32>
    %127 = vector.extract_strided_slice %126 {offsets = [0, 0], sizes = [2, 64], strides = [1, 1]} : vector<2x192xf32> to vector<2x64xf32>
    %128 = vector.extract_strided_slice %126 {offsets = [0, 64], sizes = [2, 64], strides = [1, 1]} : vector<2x192xf32> to vector<2x64xf32>
    %129 = vector.extract_strided_slice %126 {offsets = [0, 128], sizes = [2, 64], strides = [1, 1]} : vector<2x192xf32> to vector<2x64xf32>
    %130 = vector.extract_strided_slice %120 {offsets = [0, 192], sizes = [2, 64], strides = [1, 1]} : vector<2x256xf32> to vector<2x64xf32>
    %131 = math.tanh %130 : vector<2x64xf32>
    %132 = arith.mulf %128, %111 : vector<2x64xf32>
    %133 = arith.mulf %127, %131 : vector<2x64xf32>
    %134 = arith.addf %132, %133 : vector<2x64xf32>
    %135 = math.tanh %134 : vector<2x64xf32>
    %136 = arith.mulf %129, %135 : vector<2x64xf32>
    %c4_i32 = arith.constant 4 : i32
    %c0_69 = arith.constant 0 : index
    %c0_70 = arith.constant 0 : index
    %137 = vector.load %arg16[%c0_69, %c0_70] : memref<2x64xf32, #tpu.memory_space<vmem>>, vector<2x64xf32>
    tpu.vector_store %arg16[%c0_69, %c0_70], %136 {strides = array<i32>} : memref<2x64xf32, #tpu.memory_space<vmem>>, vector<2x64xf32>,
    %c0_71 = arith.constant 0 : index
    %c0_72 = arith.constant 0 : index
    %138 = vector.load %arg17[%c0_71, %c0_72] : memref<2x64xf32, #tpu.memory_space<vmem>>, vector<2x64xf32>
    tpu.vector_store %arg17[%c0_71, %c0_72], %134 {strides = array<i32>} : memref<2x64xf32, #tpu.memory_space<vmem>>, vector<2x64xf32>,
    %c1_i32_73 = arith.constant 1 : i32
    %139 = arith.cmpi eq, %arg1, %c1_i32_73 : i32
    %140 = arith.extui %139 : i1 to i32
    %c0_i32_74 = arith.constant 0 : i32
    %141 = arith.cmpi ne, %140, %c0_i32_74 : i32
    scf.if %141 {
      %c0_75 = arith.constant 0 : index
      %c0_76 = arith.constant 0 : index
      %142 = vector.load %arg3[%c0_75, %c0_76] : memref<2x32xbf16, #tpu.memory_space<vmem>>, vector<2x32xbf16>
      %c0_77 = arith.constant 0 : index
      %c0_78 = arith.constant 0 : index
      %143 = vector.load %arg7[%c0_77, %c0_78] : memref<32x64xbf16, #tpu.memory_space<vmem>>, vector<32x64xbf16>
      %cst_79 = arith.constant dense<0.000000e+00> : vector<2x64xf32>
      %144 = tpu.matmul %142, %143, %cst_79 {dimension_numbers = #tpu.dot_dimension_numbers<[1], [0], [0], [1], [0, 0, 1, 1], [], []>} : vector<2x32xbf16>, vector<32x64xbf16>, vector<2x64xf32> -> vector<2x64xf32>
      %c0_80 = arith.constant 0 : index
      %c0_81 = arith.constant 0 : index
      %145 = vector.load %arg8[%c0_80, %c0_81] : memref<1x64xf32, #tpu.memory_space<vmem>>, vector<1x64xf32>
      %146 = vector.broadcast %145 : vector<1x64xf32> to vector<2x64xf32>
      %147 = arith.addf %144, %146 : vector<2x64xf32>
      %148 = arith.truncf %136 : vector<2x64xf32> to vector<2x64xbf16>
      %c0_82 = arith.constant 0 : index
      %c0_83 = arith.constant 0 : index
      %149 = vector.load %arg9[%c0_82, %c0_83] : memref<64x32xbf16, #tpu.memory_space<vmem>>, vector<64x32xbf16>
      %cst_84 = arith.constant dense<0.000000e+00> : vector<2x32xf32>
      %150 = tpu.matmul %148, %149, %cst_84 {dimension_numbers = #tpu.dot_dimension_numbers<[1], [0], [0], [1], [0, 0, 1, 1], [], []>} : vector<2x64xbf16>, vector<64x32xbf16>, vector<2x32xf32> -> vector<2x32xf32>
      %151 = arith.truncf %147 : vector<2x64xf32> to vector<2x64xbf16>
      %c0_85 = arith.constant 0 : index
      %c0_86 = arith.constant 0 : index
      %152 = vector.load %arg10[%c0_85, %c0_86] : memref<64x32xbf16, #tpu.memory_space<vmem>>, vector<64x32xbf16>
      %cst_87 = arith.constant dense<0.000000e+00> : vector<2x32xf32>
      %153 = tpu.matmul %151, %152, %cst_87 {dimension_numbers = #tpu.dot_dimension_numbers<[1], [0], [0], [1], [0, 0, 1, 1], [], []>} : vector<2x64xbf16>, vector<64x32xbf16>, vector<2x32xf32> -> vector<2x32xf32>
      %154 = arith.addf %150, %153 : vector<2x32xf32>
      %c0_88 = arith.constant 0 : index
      %c0_89 = arith.constant 0 : index
      %155 = vector.load %arg11[%c0_88, %c0_89] : memref<1x32xf32, #tpu.memory_space<vmem>>, vector<1x32xf32>
      %156 = vector.broadcast %155 : vector<1x32xf32> to vector<2x32xf32>
      %157 = arith.addf %154, %156 : vector<2x32xf32>
      %cst_90 = arith.constant 0.000000e+00 : f32
      %158 = vector.broadcast %cst_90 : f32 to vector<2x32xf32>
      %159 = arith.maximumf %157, %158 : vector<2x32xf32>
      %160 = arith.truncf %159 : vector<2x32xf32> to vector<2x32xbf16>
      %c0_91 = arith.constant 0 : index
      %c0_92 = arith.constant 0 : index
      %161 = vector.load %arg12[%c0_91, %c0_92] : memref<32x128xbf16, #tpu.memory_space<vmem>>, vector<32x128xbf16>
      %cst_93 = arith.constant dense<0.000000e+00> : vector<2x128xf32>
      %162 = tpu.matmul %160, %161, %cst_93 {dimension_numbers = #tpu.dot_dimension_numbers<[1], [0], [0], [1], [0, 0, 1, 1], [], []>} : vector<2x32xbf16>, vector<32x128xbf16>, vector<2x128xf32> -> vector<2x128xf32>
      %c0_94 = arith.constant 0 : index
      %c0_95 = arith.constant 0 : index
      %163 = vector.load %arg13[%c0_94, %c0_95] : memref<1x128xf32, #tpu.memory_space<vmem>>, vector<1x128xf32>
      %164 = vector.broadcast %163 : vector<1x128xf32> to vector<2x128xf32>
      %165 = arith.addf %162, %164 : vector<2x128xf32>
      %c0_96 = arith.constant 0 : index
      %c0_97 = arith.constant 0 : index
      %166 = vector.load %arg14[%c0_96, %c0_97] : memref<2x128xf32, #tpu.memory_space<vmem>>, vector<2x128xf32>
      tpu.vector_store %arg14[%c0_96, %c0_97], %165 {strides = array<i32>} : memref<2x128xf32, #tpu.memory_space<vmem>>, vector<2x128xf32>,
    } else {
    }
    return
  }
  func.func @transform_0(%arg0: i32, %arg1: i32) -> (i32, i32, i32) {
    %c0_i32 = arith.constant 0 : i32
    %c0_i32_0 = arith.constant 0 : i32
    return %arg1, %arg0, %c0_i32 : i32, i32, i32
  }
  func.func @transform_1(%arg0: i32, %arg1: i32) -> (i32, i32) {
    %c0_i32 = arith.constant 0 : i32
    %c0_i32_0 = arith.constant 0 : i32
    return %arg0, %c0_i32 : i32, i32
  }
  func.func @transform_2(%arg0: i32, %arg1: i32) -> (i32, i32) {
    %c0_i32 = arith.constant 0 : i32
    %c0_i32_0 = arith.constant 0 : i32
    %c0_i32_1 = arith.constant 0 : i32
    return %c0_i32, %c0_i32_0 : i32, i32
  }
  func.func @transform_3(%arg0: i32, %arg1: i32) -> (i32, i32) {
    %c0_i32 = arith.constant 0 : i32
    %c0_i32_0 = arith.constant 0 : i32
    %c0_i32_1 = arith.constant 0 : i32
    return %c0_i32, %c0_i32_0 : i32, i32
  }
  func.func @transform_4(%arg0: i32, %arg1: i32) -> (i32, i32) {
    %c0_i32 = arith.constant 0 : i32
    %c0_i32_0 = arith.constant 0 : i32
    %c0_i32_1 = arith.constant 0 : i32
    return %c0_i32, %c0_i32_0 : i32, i32
  }
  func.func @transform_5(%arg0: i32, %arg1: i32) -> (i32, i32) {
    %c0_i32 = arith.constant 0 : i32
    %c0_i32_0 = arith.constant 0 : i32
    %c0_i32_1 = arith.constant 0 : i32
    return %c0_i32, %c0_i32_0 : i32, i32
  }
  func.func @transform_6(%arg0: i32, %arg1: i32) -> (i32, i32) {
    %c0_i32 = arith.constant 0 : i32
    %c0_i32_0 = arith.constant 0 : i32
    %c0_i32_1 = arith.constant 0 : i32
    return %c0_i32, %c0_i32_0 : i32, i32
  }
  func.func @transform_7(%arg0: i32, %arg1: i32) -> (i32, i32) {
    %c0_i32 = arith.constant 0 : i32
    %c0_i32_0 = arith.constant 0 : i32
    %c0_i32_1 = arith.constant 0 : i32
    return %c0_i32, %c0_i32_0 : i32, i32
  }
  func.func @transform_8(%arg0: i32, %arg1: i32) -> (i32, i32) {
    %c0_i32 = arith.constant 0 : i32
    %c0_i32_0 = arith.constant 0 : i32
    %c0_i32_1 = arith.constant 0 : i32
    return %c0_i32, %c0_i32_0 : i32, i32
  }
  func.func @transform_9(%arg0: i32, %arg1: i32) -> (i32, i32) {
    %c0_i32 = arith.constant 0 : i32
    %c0_i32_0 = arith.constant 0 : i32
    %c0_i32_1 = arith.constant 0 : i32
    return %c0_i32, %c0_i32_0 : i32, i32
  }
  func.func @transform_10(%arg0: i32, %arg1: i32) -> (i32, i32) {
    %c0_i32 = arith.constant 0 : i32
    %c0_i32_0 = arith.constant 0 : i32
    %c0_i32_1 = arith.constant 0 : i32
    return %c0_i32, %c0_i32_0 : i32, i32
  }
  func.func @transform_11(%arg0: i32, %arg1: i32) -> (i32, i32) {
    %c0_i32 = arith.constant 0 : i32
    %c0_i32_0 = arith.constant 0 : i32
    %c0_i32_1 = arith.constant 0 : i32
    return %c0_i32, %c0_i32_0 : i32, i32
  }
  func.func @transform_12(%arg0: i32, %arg1: i32) -> (i32, i32) {
    %c0_i32 = arith.constant 0 : i32
    %c0_i32_0 = arith.constant 0 : i32
    return %arg0, %c0_i32 : i32, i32
  }
}

</mosaic_0001>

<bundles_post_ra>
// kernel: tpu_custom_call.1
= control target key start
LH: loop header
LB: loop body
LE: loop exit
PB: predicated region body
PF: predicated region fallthrough
CT: control target
= control target key end

     0   :  { %s2751_s0 = inlined_call_operand.hbm [shape: bf16[8,2,16], index: 0, kind: input, shape index: {}]   ;;  %s2752_s1 = inlined_call_operand.hbm [shape: bf16[2,32], index: 1, kind: input, shape index: {}]   ;;  %s2753_s2 = inlined_call_operand.vmem [shape: bf16[16,256], index: 2, kind: input, shape index: {}]   ;;  %s2754_s3 = inlined_call_operand.vmem [shape: bf16[64,256], index: 3, kind: input, shape index: {}]   ;;  %s2755_s4 = inlined_call_operand.vmem [shape: f32[1,256], index: 4, kind: input, shape index: {}]   ;;  %s2756_s5 = inlined_call_operand.hbm [shape: bf16[32,64], index: 5, kind: input, shape index: {}]   ;;  %s2757_s6 = inlined_call_operand.hbm [shape: f32[1,64], index: 6, kind: input, shape index: {}]   ;;  %s2758_s7 = inlined_call_operand.vmem [shape: bf16[64,32], index: 7, kind: input, shape index: {}]   ;;  %s2759_s8 = inlined_call_operand.vmem [shape: bf16[64,32], index: 8, kind: input, shape index: {}]   ;;  %s2760_s9 = inlined_call_operand.hbm [shape: f32[1,32], index: 9, kind: input, shape index: {}]   ;;  %s2761_s10 = inlined_call_operand.vmem [shape: bf16[32,128], index: 10, kind: input, shape index: {}]   ;;  %s2762_s11 = inlined_call_operand.vmem [shape: f32[1,128], index: 11, kind: input, shape index: {}]   ;;  %s2763_s12 = inlined_call_operand.hbm [shape: f32[2,128], index: 12, kind: output, shape index: {}]  }
   0x1   :  { %2772 = sst [smem:[#allocation19_spill]] %s2752_s1 }
   0x2   :  { %2773 = sst [smem:[#allocation20_spill]] %s2757_s6 }
   0x3   :  { %2774 = sst [smem:[#allocation21_spill]] %s2758_s7 }
   0x4   :  { %2775 = sst [smem:[#allocation22_spill]] %s2761_s10 }
   0x5   :  { %2776 = sst [smem:[#allocation23_spill]] %s2762_s11 }
   0x6   :  { %2777 = sst [smem:[#allocation24_spill]] %s2763_s12 }
   0x7   :  { %17 = vsyncpa [#allocation6], 0 }
   0x8   :  { %19 = vsyncpa [#allocation6 + $0x1], 0 }
   0x9   :  { %20 = vsyncpa [#allocation9], 0 }
   0xa   :  { %21 = vsyncpa [#allocation12], 0 }
   0xb   :  { %22 = vsyncpa [#allocation7], 0  ;;  %s2291_s21 = smov 0   ;;  %s2293_s22 = smov 0  }
   0xc   :  { %s2295_s23 = smov 0   ;;  %s2297_s24 = smov 0  }
   0xd   :  { %s2299_s25 = smov 0   ;;  %s2301_s26 = smov 0  }
   0xe LB: > { %s2764_s27 = sadd.s32 4294967295, %s2208_s26   ;;  %p62_p0 = scmp.ne.s32.totalorder %s2192_s22, %s2188_s21  ;;  %s2208_s26 = sphi %s2301_s26, %s28_s26   ;;  %s2204_s25 = sphi %s2299_s25, %s2800_s25   ;;  %s2200_s24 = sphi %s2297_s24, %s2799_s24   ;;  %s2196_s23 = sphi %s2295_s23, %s2798_s23   ;;  %s2192_s22 = sphi %s2293_s22, %s2797_s22   ;;  %s2188_s21 = sphi %s2291_s21, %s2796_s21  }
   0xf   : > { %p2323_p1 = scmp.eq.s32.totalorder %s2764_s27, 0  ;;  %p1673_p2 = scmp.ge.s32.totalorder %s2208_s26, 1 }
  0x10   : > { %p335_p3 = scmp.lt.s32.totalorder %s2208_s26, 3  ;;  %s2210_s13 = smov [#allocation8]  }
  0x11   : > { %s2778_s28 = scalar_select %p2323_p1, 1, 0 }
  0x12   : > { %p2331_p4 = por %p2323_p1, %p62_p0  ;;  %p2335_p5 = pnand %p1673_p2, %p335_p3 }
  0x13   : > { %s350_s14 = sshll.u32 %s2210_s13, 4  ;;  %s2211_s15 = smov [#allocation11]   ;;  %s351_s14 = int_to_ptr.vmem [resolvable:$true] %s350_s14 }
  0x14   : > { %s2779_s29 = scalar_select %p2331_p4, 1, 0 }
  0x15   : > { %s2780_s30 = scalar_select %p2335_p5, 1, 0 }
  0x16   : > { %p1828_p6 = pneg %p2335_p5  ;;  %s383_s16 = sshll.u32 %s2211_s15, 4  ;;  %s2347_s16 = int_to_ptr.vmem [resolvable:$true] %s383_s16 }
  0x17   : > { %s2212_s18 = smov [#allocation10]   ;;  %s2782_s1 = sld [smem:[#allocation19_spill]] }
  0x18   : > { %p2343_p7 = pnand %p1828_p6, %p2323_p1  ;;  %s369_s19 = sshll.u32 %s2212_s18, 4  ;;  %s2349_s19 = int_to_ptr.vmem [resolvable:$true] %s369_s19 }
  0x1a   : > { %p2359_p9 = pneg %p2343_p7 }
  0x1d   : > { %s1978_s13 = scalar_lea.hbm %s2782_s1, 16 }
  0x1e   : > { %p1979_p8 = scmp.ne.s32.totalorder %s2782_s1, %s1978_s13  ;;  %p1985_p12 = scmp.lt.u32.totalorder %s1978_s13, %s2782_s1 }
  0x20   : > { %p1981_p10 = pnand %p2359_p9, %p1979_p8 }
  0x22   : > { %p1982_p11 = pneg %p1981_p10 }
  0x24   : > { %p1987_p13 = pnand %p1985_p12, %p1982_p11 }
  0x26   : > { %1990 = shalt.err (!%p1987_p13)
}
  0x27   : > { %s1991_s20 = scalar_lea.vmem %s351_s14, 16  ;;  %s1998_s12 = scalar_lea.vmem %s351_s14, 32 }
  0x28   : > { %p1992_p0 = scmp.ne.s32.totalorder %s351_s14, %s1991_s20  ;;  %p1999_p6 = scmp.lt.s32.totalorder %s351_s14, %s351_s14 }
  0x29   : > { %p2000_p1 = scmp.lt.s32.totalorder %s1998_s12, %s1991_s20 }
  0x2a   : > { %p1994_p2 = pnand %p1992_p0, %p2359_p9 }
  0x2b   : > { %p2001_p4 = por %p2000_p1, %p1999_p6 }
  0x2c   : > { %p1995_p3 = pneg %p1994_p2 }
  0x2e   : > { %p2002_p5 = pnand %p2001_p4, %p1995_p3 }
  0x30   : > { %2005 = shalt.err (!%p2002_p5)
}
  0x31   : > { %1831 = dma.hbm_to_vmem [thread:$0]  (!%p2343_p7), %s2782_s1, 16, %s351_s14, [#allocation9]  }
  0x32   : > { %s2784_s6 = sld [smem:[#allocation20_spill]] }
  0x38   : > { %s2006_s18 = scalar_lea.hbm %s2784_s6, 16 }
  0x39   : > { %p2007_p8 = scmp.ne.s32.totalorder %s2784_s6, %s2006_s18  ;;  %p2013_p4 = scmp.lt.u32.totalorder %s2006_s18, %s2784_s6 }
  0x3b   : > { %p2009_p10 = pnand %p2007_p8, %p2359_p9 }
  0x3d   : > { %p2010_p1 = pneg %p2009_p10 }
  0x3f   : > { %p2015_p5 = pnand %p2013_p4, %p2010_p1 }
  0x41   : > { %2018 = shalt.err (!%p2015_p5)
}
  0x42   : > { %s2019_s14 = scalar_lea.vmem %s2347_s16, 16  ;;  %s2026_s7 = scalar_lea.vmem %s2347_s16, 32 }
  0x43   : > { %p2020_p11 = scmp.ne.s32.totalorder %s2347_s16, %s2019_s14  ;;  %p2027_p0 = scmp.lt.s32.totalorder %s2347_s16, %s2347_s16 }
  0x44   : > { %p2028_p2 = scmp.lt.s32.totalorder %s2026_s7, %s2019_s14 }
  0x45   : > { %p2022_p12 = pnand %p2020_p11, %p2359_p9 }
  0x46   : > { %p2029_p3 = por %p2028_p2, %p2027_p0 }
  0x47   : > { %p2023_p13 = pneg %p2022_p12 }
  0x49   : > { %p2030_p6 = pnand %p2029_p3, %p2023_p13 }
  0x4b   : > { %2033 = shalt.err (!%p2030_p6)
}
  0x4c   : > { %1837 = dma.hbm_to_vmem [thread:$0]  (!%p2343_p7), %s2784_s6, 16, %s2347_s16, [#allocation12]  }
  0x4d   : > { %s2034_s13 = scalar_lea.hbm %s2756_s5, 256 }
  0x4e   : > { %p2035_p8 = scmp.ne.s32.totalorder %s2756_s5, %s2034_s13  ;;  %p2041_p4 = scmp.lt.u32.totalorder %s2034_s13, %s2756_s5 }
  0x50   : > { %p2037_p10 = pnand %p2035_p8, %p2359_p9 }
  0x52   : > { %p2038_p1 = pneg %p2037_p10 }
  0x54   : > { %p2043_p5 = pnand %p2041_p4, %p2038_p1 }
  0x56   : > { %2046 = shalt.err (!%p2043_p5)
}
  0x57   : > { %s2047_s16 = scalar_lea.vmem %s2349_s19, 256  ;;  %p2055_p0 = scmp.lt.s32.totalorder %s2349_s19, %s2349_s19 }
  0x58   : > { %p2048_p11 = scmp.ne.s32.totalorder %s2349_s19, %s2047_s16  ;;  %p2056_p2 = scmp.lt.s32.totalorder %s2047_s16, %s2047_s16 }
  0x5a   : > { %p2050_p12 = pnand %p2048_p11, %p2359_p9  ;;  %p2057_p3 = por %p2056_p2, %p2055_p0 }
  0x5c   : > { %p2051_p13 = pneg %p2050_p12 }
  0x5e   : > { %p2058_p6 = pnand %p2057_p3, %p2051_p13 }
  0x60   : > { %2061 = shalt.err (!%p2058_p6)
}
  0x61   : > { %s2213_s7 = smov 64   ;;  %s2214_s10 = smov 4  }
  0x62   : > { %1834 = dma.hbm_to_vmem [thread:$0]  (!%p2343_p7), %s2756_s5, 256, %s2349_s19, [#allocation9], %s2213_s7, %s2213_s7, %s2214_s10  }
  0x63   : > { %s2215_s11 = smov [#allocation13]   ;;  %s2062_s12 = scalar_lea.hbm %s2760_s9, 16 }
  0x64   : > { %s400_s13 = sshll.u32 %s2215_s11, 4  ;;  %p2063_p8 = scmp.ne.s32.totalorder %s2760_s9, %s2062_s12  ;;  %s401_s13 = int_to_ptr.vmem [resolvable:$true] %s400_s13 }
  0x65   : > { %p2069_p4 = scmp.lt.u32.totalorder %s2062_s12, %s2760_s9 }
  0x66   : > { %p2065_p10 = pnand %p2063_p8, %p2359_p9 }
  0x68   : > { %p2066_p1 = pneg %p2065_p10 }
  0x6a   : > { %p2071_p5 = pnand %p2069_p4, %p2066_p1 }
  0x6c   : > { %2074 = shalt.err (!%p2071_p5)
}
  0x6d   : > { %s2075_s19 = scalar_lea.vmem %s401_s13, 16  ;;  %s2082_s7 = scalar_lea.vmem %s401_s13, 32 }
  0x6e   : > { %p2076_p11 = scmp.ne.s32.totalorder %s401_s13, %s2075_s19  ;;  %p2083_p0 = scmp.lt.s32.totalorder %s401_s13, %s401_s13 }
  0x6f   : > { %p2084_p2 = scmp.lt.s32.totalorder %s2082_s7, %s2075_s19 }
  0x70   : > { %p2078_p12 = pnand %p2076_p11, %p2359_p9 }
  0x71   : > { %p2085_p3 = por %p2084_p2, %p2083_p0 }
  0x72   : > { %p2079_p13 = pneg %p2078_p12 }
  0x74   : > { %p2086_p6 = pnand %p2085_p3, %p2079_p13 }
  0x76   : > { %2089 = shalt.err (!%p2086_p6)
}
  0x77   : > { %1840 = dma.hbm_to_vmem [thread:$0]  (!%p2343_p7), %s2760_s9, 16, %s401_s13, [#allocation12]  }
  0x78   : > { %s37_s1 = sadd.s32 1, %s2204_s25  ;;  %s49_s6 = sadd.s32 1, %s2196_s23 }
  0x79   : > { %p38_p9 = scmp.ge.s32.totalorder %s37_s1, 2  ;;  %p56_p8 = scmp.ne.s32.totalorder %s2196_s23, %s2192_s22 }
  0x7a   : > { %p57_p10 = scmp.eq.s32.totalorder %s2208_s26, 0  ;;  %p1849_p1 = scmp.lt.s32.totalorder %s2208_s26, 2 }
  0x7b   : > { %s2802_s1 = smov (%p38_p9, %s37_s1), 0  ;;  %s417_s17 = sand.u32 1, %s2196_s23  }
  0x7c   : > { %p58_p4 = por %p57_p10, %p56_p8  ;;  %s44_s15 = ssub.s32 %s2204_s25, %s2802_s1 }
  0x7d   : > { %p47_p5 = scmp.eq.s32.totalorder %s44_s15, 0  ;;  %s1679_s21 = sshll.u32 %s417_s17, 2 }
  0x7e   : > { %s1749_s11 = sshll.u32 %s2204_s25, 6  ;;  %s421_s14 = scalar_lea.vmem [#allocation5], %s1679_s21 }
  0x7f   : > { %s2453_s18 = scalar_select %p47_p5, %s2196_s23, %s49_s6  }
  0x80   : > { %s2458_s12 = scalar_lea.hbm %s2751_s0, %s1749_s11  ;;  %s429_s16 = sshll.u32 %s421_s14, 4  ;;  %s2460_s16 = int_to_ptr.vmem [resolvable:$true] %s429_s16 }
  0x81   : > { %p2464_p7 = pnand %p1849_p1, %p58_p4  ;;  %s2468_s7 = scalar_lea.sflag [#allocation6], %s417_s17 }
  0x82   : > { %s2090_s10 = scalar_lea.hbm %s2458_s12, 64  ;;  %s2095_s15 = scalar_lea.hbm %s2751_s0, 128 }
  0x83   : > { %p2091_p11 = scmp.ne.s32.totalorder %s2458_s12, %s2090_s10  ;;  %p2092_p12 = pneg %p2464_p7 }
  0x84   : > { %p2096_p2 = scmp.lt.u32.totalorder %s2458_s12, %s2751_s0  ;;  %p2097_p3 = scmp.lt.u32.totalorder %s2095_s15, %s2090_s10 }
  0x85   : > { %p2093_p13 = pnand %p2092_p12, %p2091_p11  ;;  %p2099_p9 = scmp.lt.u32.totalorder %s2090_s10, %s2458_s12 }
  0x86   : > { %p2098_p6 = por %p2097_p3, %p2096_p2 }
  0x87   : > { %p2094_p0 = pneg %p2093_p13 }
  0x88   : > { %p2100_p8 = por %p2099_p9, %p2098_p6 }
  0x8a   : > { %p2101_p10 = pnand %p2100_p8, %p2094_p0 }
  0x8c   : > { %2104 = shalt.err (!%p2101_p10)
}
  0x8d   : > { %s2105_s17 = scalar_lea.vmem %s2460_s16, 64  ;;  %s2216_s20 = smov [#allocation5]  }
  0x8e   : > { %p2106_p1 = scmp.ne.s32.totalorder %s2460_s16, %s2105_s17  ;;  %s2110_s13 = sshll.u32 %s2216_s20, 4  ;;  %s2111_s13 = int_to_ptr.vmem [resolvable:$false] %s2110_s13 }
  0x8f   : > { %s2112_s14 = scalar_lea.vmem %s2111_s13, 128  ;;  %p2113_p11 = scmp.lt.s32.totalorder %s2460_s16, %s2111_s13 }
  0x90   : > { %p2108_p4 = pnand %p2106_p1, %p2092_p12  ;;  %p2114_p13 = scmp.lt.s32.totalorder %s2112_s14, %s2105_s17 }
  0x92   : > { %p2109_p5 = pneg %p2108_p4  ;;  %p2115_p2 = por %p2114_p13, %p2113_p11 }
  0x94   : > { %p2116_p3 = pnand %p2115_p2, %p2109_p5 }
  0x96   : > { %2119 = shalt.err (!%p2116_p3)
}
  0x97   : > { %s2217_s10 = smov 16   ;;  %s2218_s27 = smov 1  }
  0x98   : > { %1844 = dma.hbm_to_vmem [thread:$0]  (!%p2464_p7), %s2458_s12, 64, %s2460_s16, %s2468_s7, %s2217_s10, %s2217_s10, %s2218_s27  }
  0x99   : > { %p2786_p12 = scmp.ne.s32.totalorder %s2780_s30, 0 }
  0x9a   : > { %s443_s6 = sand.u32 (!%p2786_p12), 1, %s2192_s22   ;;  %p2787_p0 = scmp.ne.s32.totalorder (!%p2786_p12), %s2779_s29, 0 }
  0x9b   : > { %441 = sbr.rel (%p2786_p12) target bundleno = 3147 (0xc4b), region = 68  ;;  %s1683_s15 = sshll.u32 (!%p2786_p12), %s443_s6, 2 }
  0x9c   : > { %s444_s21 = scalar_lea.sflag (!%p2786_p12), [#allocation6], %s443_s6  ;;  %s2499_s11 = scalar_lea.vmem (!%p2786_p12), [#allocation5], %s1683_s15 }
  0xa2   : > { %2171 = dma.done.wait (%p2787_p0), %s444_s21, 64  }
  0xa3   : > { %2173 = vsyncadd (%p2787_p0), %s444_s21, 4294967232  ;;  %p2788_p6 = scmp.ne.s32.totalorder %s2778_s28, 0 }
  0xa5   : > { %2175 = dma.done.wait (%p2788_p6), [#allocation9], 272  }
  0xa6   : > { %2177 = vsyncadd (%p2788_p6), [#allocation9], 4294967024 }
  0xa7   : > { %2179 = dma.done.wait (%p2788_p6), [#allocation12], 32  }
  0xa8   : > { %2181 = vsyncadd (%p2788_p6), [#allocation12], 4294967264  ;;  %p1688_p7 = scmp.ne.s32.totalorder %s2200_s24, 0 }
  0xa9   : > { %vm505_vm0 = vcmask (!%p1688_p7), 517120   ;;  %v2219_v0 = vmov (!%p1688_p7), 0.0  }
  0xaa   : > { %504 = sbr.rel (%p1688_p7) target bundleno = 177 (0xb1), region = 92  ;;  %506 = vst.msk [vmem:[#allocation3] sm:$0x3] (!%p1688_p7), %vm505_vm0, %v2219_v0  ;;  %507 = vst.msk [vmem:[#allocation4] sm:$0x3] (!%p1688_p7), %vm505_vm0, %v2219_v0 }
  0xb1 PF: > { %v1919_v1 = vld [vmem:[%s2753_s2 + $0x4] ss:$8 sps:$4 sm:$0xff]   ;;  %v2520_v2 = vld [vmem:[%s2753_s2] ss:$8 sps:$4 sm:$0xff]   ;;  %v2220_v3 = vmov 0   ;;  %vm533_vm1 = vcmask 130048   ;;  %v513_v16 = vlaneseq }
  0xb2   : > { %569 = vmatprep.mubr.bf16.mxu0 %v2220_v3  ;;  %651 = vmatprep.mubr.bf16.mxu1 %v2220_v3  ;;  %v508_v4 = vld [vmem:[%s2499_s11] sm:$0x1]  ;;  %v2530_v5 = vld [vmem:[%s2754_s3 + $0x4] ss:$8 sps:$4 sm:$0xff]   ;;  %v1698_v6 = vld [vmem:[%s2499_s11 + $0x2] sm:$0x1] }
  0xb3   : > { %537 = vmatprep.subr.bf16.mxu0 %v1919_v1  ;;  %619 = vmatprep.subr.bf16.mxu1 %v1919_v1  ;;  %v2540_v7 = vld [vmem:[%s2754_s3] ss:$8 sps:$4 sm:$0xff]   ;;  %v2545_v8 = vld [vmem:[%s2754_s3 + $0x14] ss:$8 sps:$4 sm:$0xff]   ;;  %v2552_v9 = vld [vmem:[%s2754_s3 + $0x10] ss:$8 sps:$4 sm:$0xff]  }
  0xb4   : > { %538 = vmatpush1.bf16.msra.mxu0 %v2520_v2  ;;  %620 = vmatpush1.bf16.msra.mxu1 %v2520_v2  ;;  %v2559_v10 = vld [vmem:[%s2754_s3 + $0x24] ss:$8 sps:$4 sm:$0xff]   ;;  %v2565_v11 = vld [vmem:[%s2754_s3 + $0x20] ss:$8 sps:$4 sm:$0xff]   ;;  %v2571_v12 = vld [vmem:[%s2754_s3 + $0x34] ss:$8 sps:$4 sm:$0xff]  }
  0xb5   : > { %702 = vmatprep.subr.bf16.mxu0 %v1919_v1  ;;  %785 = vmatprep.subr.bf16.mxu1 %v1919_v1  ;;  %v2577_v13 = vld [vmem:[%s2754_s3 + $0x30] ss:$8 sps:$4 sm:$0xff]   ;;  %vm891_vm2 = vcmask 523264   ;;  %v514_v17 = vshrl.u32 %v513_v16, 7  ;;  %v511_v19 = vld [vmem:[%s2755_s4] sm:$0x3] }
  0xb6   : > { %v839_v14 = vld [vmem:[#allocation3] sm:$0x3]  ;;  %v677_v28 = vld [vmem:[%s2755_s4] sm:$0x3]  ;;  %v2221_v40 = vmov 1983009808  }
  0xb7   : > { %1691 = vmatmul.mubr.msk.bf16.vlgmr.msra.gmra.mrb[0].mxu0 %vm533_vm1, %v508_v4  ;;  %v842_v15 = vpack.c.bf16 %v839_v14, %v839_v14  ;;  %v2591_v18 = vsub.s32 0, %v514_v17  ;;  %v2596_v20 = vsub.s32 1, %v514_v17  ;;  %v940_v41 = vunpack.c.l.s4 %v2221_v40  ;;  %s2222_s20 = smov 64   ;;  %v1693_v61 = vld [vmem:[%s2499_s11 + $0x1] sm:$0x1]  ;;  %p1725_p9 = scmp.ne.s32.totalorder %s2200_s24, 1 }
  0xb8   : > { %703 = vmatpush1.bf16.msra.mxu0 %v2520_v2  ;;  %734 = vmatprep.mubr.bf16.mxu0 %v2220_v3  ;;  %v1718_v52 = vld.sshfl [vmem:[#allocation4] sm:$0x3 pattern:$0x76325410]  ;;  %v1703_v62 = vld [vmem:[%s2499_s11 + $0x3] sm:$0x1] }
  0xb9   : > { %895 = vmatprep.subr.bf16.mxu0 %v2530_v5  ;;  %v516_v21 = vrot.slane %v511_v19, %v2591_v18  ;;  %v520_v22 = vrot.slane %v511_v19, %v2596_v20  ;;  %v682_v31 = vrot.slane %v677_v28, %v2591_v18  ;;  %v686_v32 = vrot.slane %v677_v28, %v2596_v20  ;;  %s2789_s21 = sld [smem:[#allocation21_spill]] (!%p1725_p9)  ;;  %s2791_s15 = sld [smem:[#allocation22_spill]] (!%p1725_p9) }
  0xba   : > { %v941_v42 = vunpack.c.0.s8 %v940_v41  ;;  %1696 = vmatmul.mubr.msk.bf16.vlgmr.msra.gmra.mrb[0].mxu1 %vm533_vm1, %v1693_v61  ;;  %vm1245_vm3 = vcmask 517120   ;;  %vm2224_vm4 = vmmov (!%p1725_p9), 0   ;;  %vm1287_vm5 = vcmask (!%p1725_p9), 261120   ;;  %s2792_s16 = sld [smem:[#allocation23_spill]] (!%p1725_p9) }
  0xbb   : > { %786 = vmatpush1.bf16.msra.mxu1 %v2520_v2  ;;  %817 = vmatprep.mubr.bf16.mxu1 %v2220_v3 }
  0xbc   : > { %v2605_v44 = vsub.s32 %v941_v42, %v514_v17  ;;  %992 = vmatprep.subr.bf16.mxu1 %v2530_v5 }
  0xbf   : > { %1701 = vmatmul.mubr.msk.bf16.vlgmr.msra.gmra.mrb[4].mxu0 %vm533_vm1, %v1698_v6  ;;  %v594_v6 = vld [vmem:[%s2755_s4] sm:$0x3]  ;;  %s2790_s29 = smov (!%p1725_p9), %s2789_s21 }
  0xc0   : > { %896 = vmatpush1.bf16.msra.mxu0 %v2540_v7  ;;  %927 = vmatprep.mubr.bf16.mxu0 %v2220_v3  ;;  %v599_v14 = vrot.slane %v594_v6, %v2591_v18 }
  0xc1   : > { %897 = vmatprep.subr.bf16.mxu0 %v2545_v8 }
  0xc2   : > { %1706 = vmatmul.mubr.msk.bf16.vlgmr.msra.gmra.mrb[4].mxu1 %vm533_vm1, %v1703_v62 }
  0xc3   : > { %993 = vmatpush1.bf16.msra.mxu1 %v2540_v7  ;;  %1024 = vmatprep.mubr.bf16.mxu1 %v2220_v3 }
  0xc4   : > { %898 = vmatpush1.bf16.msra.mxu0 %v2552_v9  ;;  %994 = vmatprep.subr.bf16.mxu1 %v2545_v8 }
  0xc5   : > { %899 = vmatprep.subr.bf16.mxu0 %v2559_v10 }
  0xc7   : > { %995 = vmatpush1.bf16.msra.mxu1 %v2552_v9 }
  0xc8   : > { %900 = vmatpush1.bf16.msra.mxu0 %v2565_v11  ;;  %996 = vmatprep.subr.bf16.mxu1 %v2559_v10 }
  0xc9   : > { %901 = vmatprep.subr.bf16.mxu0 %v2571_v12 }
  0xcb   : > { %997 = vmatpush1.bf16.msra.mxu1 %v2565_v11 }
  0xcc   : > { %902 = vmatpush1.bf16.msra.mxu0 %v2577_v13  ;;  %998 = vmatprep.subr.bf16.mxu1 %v2571_v12 }
  0xcd   : > { %1078 = vmatprep.subr.bf16.mxu0 %v2530_v5 }
  0xcf   : > { %1716 = vmatmul.mubr.msk.bf16.vlgmr.msra.gmra.mrb[8].mxu0 %vm891_vm2, %v842_v15  ;;  %999 = vmatpush1.bf16.msra.mxu1 %v2577_v13  ;;  %v603_v15 = vrot.slane %v594_v6, %v2596_v20 }
  0xd0   : > { %1079 = vmatpush1.bf16.msra.mxu0 %v2540_v7  ;;  %1110 = vmatprep.mubr.bf16.mxu0 %v2220_v3 }
  0xd1   : > { %1080 = vmatprep.subr.bf16.mxu0 %v2545_v8  ;;  %1164 = vmatprep.subr.bf16.mxu1 %v2530_v5 }
  0xd4   : > { %1081 = vmatpush1.bf16.msra.mxu0 %v2552_v9 }
  0xd5   : > { %1082 = vmatprep.subr.bf16.mxu0 %v2559_v10 }
  0xd8   : > { %1083 = vmatpush1.bf16.msra.mxu0 %v2565_v11 }
  0xd9   : > { %1084 = vmatprep.subr.bf16.mxu0 %v2571_v12 }
  0xdc   : > { %1085 = vmatpush1.bf16.msra.mxu0 %v2577_v13 }
 0x18a   : > { %v571_v23 = vpop.f32.mrb[0].mxu0 }
 0x18b   : > { %v572_v24 = vadd.f32 %v571_v23, %v516_v21  ;;  %v573_v25 = vpop.f32.mrb[1].mxu0 }
 0x18c   : > { %v574_v26 = vadd.f32 %v573_v25, %v520_v22  ;;  %v575_v27 = vpop.f32.mrb[2].mxu0  ;;  %v760_v22 = vld [vmem:[%s2755_s4] sm:$0x3] }
 0x18d   : > { %v576_v29 = vpop.f32.mrb[3].mxu0  ;;  %v653_v16 = vpop.f32.mrb[0].mxu1  ;;  %v765_v25 = vrot.slane %v760_v22, %v2591_v18 }
 0x18e   : > { %v580_v30 = vcombine.low %v572_v24, %v574_v26  ;;  %v654_v17 = vadd.f32 %v653_v16, %v599_v14  ;;  %v655_v19 = vpop.f32.mrb[1].mxu1  ;;  %v769_v26 = vrot.slane %v760_v22, %v2596_v20 }
 0x18f   : > { %v656_v5 = vadd.f32 %v655_v19, %v603_v15  ;;  %v657_v21 = vpop.f32.mrb[2].mxu1 }
 0x190   : > { %1692 = vst.sshfl [vmem:[#allocation2] sm:$0x33 pattern:$0x76325410] %v580_v30  ;;  %v658_v23 = vpop.f32.mrb[3].mxu1 }
 0x191   : > { %v662_v24 = vcombine.low %v654_v17, %v656_v5 }
 0x192   : > { %v736_v33 = vpop.f32.mrb[4].mxu0 }
 0x193   : > { %v737_v34 = vadd.f32 %v736_v33, %v682_v31  ;;  %v738_v35 = vpop.f32.mrb[5].mxu0  ;;  %1697 = vst.sshfl [vmem:[#allocation2 + $0x4] sm:$0x33 pattern:$0x76325410] %v662_v24 }
 0x194   : > { %v739_v36 = vadd.f32 %v738_v35, %v686_v32  ;;  %v740_v37 = vpop.f32.mrb[6].mxu0 }
 0x195   : > { %v741_v38 = vpop.f32.mrb[7].mxu0  ;;  %v819_v27 = vpop.f32.mrb[4].mxu1 }
 0x196   : > { %v745_v39 = vcombine.low %v737_v34, %v739_v36  ;;  %v820_v28 = vadd.f32 %v819_v27, %v765_v25  ;;  %v821_v29 = vpop.f32.mrb[5].mxu1 }
 0x197   : > { %v841_v50 = vld [vmem:[#allocation2] sm:$0xf]  ;;  %v822_v30 = vadd.f32 %v821_v29, %v769_v26  ;;  %v823_v31 = vpop.f32.mrb[6].mxu1 }
 0x198   : > { %1702 = vst.sshfl [vmem:[#allocation2 + $0x8] sm:$0x33 pattern:$0x76325410] %v745_v39  ;;  %v824_v32 = vpop.f32.mrb[7].mxu1 }
 0x199   : > { %v828_v33 = vcombine.low %v820_v28, %v822_v30 }
 0x19b   : > { %1707 = vst.sshfl [vmem:[#allocation2 + $0xc] sm:$0x33 pattern:$0x76325410] %v828_v33 }
 0x1a2   : > { %v929_v43 = vpop.f32.mrb[8].mxu0  ;;  %v1159_v29 = vld [vmem:[#allocation2 + $0xc] sm:$0xf] }
 0x1a3   : > { %v931_v45 = vpop.f32.mrb[9].mxu0 }
 0x1a4   : > { %v938_v46 = vcombine.low %v929_v43, %v931_v45  ;;  %v933_v47 = vpop.f32.mrb[10].mxu0 }
 0x1a5   : > { %v934_v48 = vpop.f32.mrb[11].mxu0 }
 0x1a6   : > { %v945_v49 = vrot.slane %v938_v46, %v2605_v44 }
 0x1a8   : > { %v947_v51 = vadd.f32 %v945_v49, %v841_v50 }
 0x1aa   : > { %955 = vrot.lane.b32.xlu0 %v947_v51, %s2222_s20  ;;  %v1717_v53 = vmul.f32 -1.442695, %v947_v51 }
 0x1ac   : > { %1934 = vpow2.f32 %v1717_v53 }
 0x1ae   : > { %968 = vrot.lane.b32.xlu0 %v1718_v52, %s2222_s20 }
 0x1b6   : > { %v1935_v54 = vpop.eup %1934 }
 0x1b7   : > { %v951_v55 = vadd.f32 1.0, %v1935_v54 }
 0x1b9   : > { %1936 = vrcp.f32 %v951_v55 }
 0x1c3   : > { %v1937_v58 = vpop.eup %1936 }
 0x1c4   : > { %v980_v34 = vrot.slane %v1937_v58, 2 }
 0x21c   : > { %v956_v56 = vpop.permute.xlu0 %955 }
 0x21d   : > { %v957_v57 = vrot.slane %v956_v56, 2 }
 0x21f   : > { %1938 = vtanh.f32 %v957_v57 }
 0x220   : > { %v969_v63 = vpop.permute.xlu0 %968 }
 0x221   : > { %v971_v0 = vmul.f32 %v1937_v58, %v969_v63 }
 0x229   : > { %v1939_v59 = vpop.eup %1938 }
 0x22a   : > { %v972_v60 = vmul.f32 %v1939_v59, %v1937_v58  ;;  %v1073_v59 = vld [vmem:[#allocation2 + $0x8] sm:$0xf] }
 0x22c   : > { %974 = vrot.lane.b32.xlu1 %v972_v60, %s2222_s20 }
 0x29e   : > { %v975_v1 = vpop.permute.xlu1 %974 }
 0x29f   : > { %v977_v2 = vadd.f32 %v975_v1, %v971_v0 }
 0x2a1   : > { %1940 = vtanh.f32 %v977_v2 }
 0x2ab   : > { %v1941_v4 = vpop.eup %1940 }
 0x2ac   : > { %983 = vrot.lane.b32.xlu1 %v1941_v4, %s2222_s20 }
 0x31e   : > { %v984_v35 = vpop.permute.xlu1 %983 }
 0x31f   : > { %v986_v36 = vmul.f32 %v984_v35, %v980_v34 }
 0x321   : > { %v988_v37 = vpack.c.bf16 %v986_v36, %v986_v36 }
 0x323   : > { %1719 = vmatmul.mubr.msk.bf16.vlgmr.msra.gmra.mrb[8].mxu1 %vm891_vm2, %v988_v37 }
 0x324   : > { %1165 = vmatpush1.bf16.msra.mxu1 %v2540_v7  ;;  %1196 = vmatprep.mubr.bf16.mxu1 %v2220_v3  ;;  %v987_v3 = vld [vmem:[#allocation2 + $0x4] sm:$0xf] }
 0x325   : > { %1166 = vmatprep.subr.bf16.mxu1 %v2545_v8 }
 0x328   : > { %1167 = vmatpush1.bf16.msra.mxu1 %v2552_v9 }
 0x329   : > { %1168 = vmatprep.subr.bf16.mxu1 %v2559_v10 }
 0x32c   : > { %1169 = vmatpush1.bf16.msra.mxu1 %v2565_v11 }
 0x32d   : > { %1170 = vmatprep.subr.bf16.mxu1 %v2571_v12 }
 0x330   : > { %1171 = vmatpush1.bf16.msra.mxu1 %v2577_v13 }
 0x3f6   : > { %v1026_v18 = vpop.f32.mrb[8].mxu1 }
 0x3f7   : > { %v1028_v20 = vpop.f32.mrb[9].mxu1 }
 0x3f8   : > { %v1035_v38 = vcombine.low %v1026_v18, %v1028_v20  ;;  %v1030_v39 = vpop.f32.mrb[10].mxu1 }
 0x3f9   : > { %v1031_v40 = vpop.f32.mrb[11].mxu1 }
 0x3fa   : > { %v1042_v7 = vrot.slane %v1035_v38, %v2605_v44 }
 0x3fc   : > { %v1044_v41 = vadd.f32 %v1042_v7, %v987_v3 }
 0x3fe   : > { %1052 = vrot.lane.b32.xlu0 %v1044_v41, %s2222_s20  ;;  %v1720_v8 = vmul.f32 -1.442695, %v1044_v41 }
 0x400   : > { %1942 = vpow2.f32 %v1720_v8 }
 0x40a   : > { %v1943_v9 = vpop.eup %1942 }
 0x40b   : > { %v1048_v10 = vadd.f32 1.0, %v1943_v9 }
 0x40d   : > { %1944 = vrcp.f32 %v1048_v10  ;;  %v1966_v10 = vld [vmem:[#allocation10] sm:$0xff] (!%p1725_p9)  }
 0x417   : > { %v1945_v12 = vpop.eup %1944 }
 0x418   : > { %v1057_v45 = vmul.f32 %v1945_v12, %v977_v2  ;;  %v1066_v49 = vrot.slane %v1945_v12, 2 }
 0x470   : > { %v1053_v11 = vpop.permute.xlu0 %1052 }
 0x471   : > { %v1054_v42 = vrot.slane %v1053_v11, 2  ;;  %v2223_v11 = vmov (!%p1725_p9), 0.0  }
 0x472   : > { %1766 = vmatprep.subr.bf16.mxu0 (!%p1725_p9), %v2223_v11  ;;  %1774 = vmatprep.subr.bf16.mxu1 (!%p1725_p9), %v2223_v11 }
 0x473   : > { %1946 = vtanh.f32 %v1054_v42  ;;  %v1263_v42 = vld [vmem:[#allocation8] sm:$0x1] (!%p1725_p9) }
 0x47d   : > { %v1947_v13 = vpop.eup %1946 }
 0x47e   : > { %v1058_v43 = vmul.f32 %v1947_v13, %v1945_v12  ;;  %v1969_v12 = vld [vmem:[%s2759_s8] sm:$0xff] (!%p1725_p9)  }
 0x47f   : > { %v1968_v13 = vld [vmem:[%s2789_s21] sm:$0xff] (!%p1725_p9)  }
 0x480   : > { %1060 = vrot.lane.b32.xlu1 %v1058_v43, %s2222_s20  ;;  %v1971_v43 = vld [vmem:[%s2759_s8 + $0x8] sm:$0xff] (!%p1725_p9)  }
 0x4f2   : > { %v1061_v46 = vpop.permute.xlu1 %1060 }
 0x4f3   : > { %v1063_v47 = vadd.f32 %v1061_v46, %v1057_v45  ;;  %v1970_v45 = vld [vmem:[%s2790_s29 + $0x8] sm:$0xff] (!%p1725_p9)   ;;  %v1973_v46 = vld [vmem:[%s2759_s8 + $0x10] sm:$0xff] (!%p1725_p9)  }
 0x4f5   : > { %1948 = vtanh.f32 %v1063_v47 }
 0x4ff   : > { %v1949_v48 = vpop.eup %1948 }
 0x500   : > { %1069 = vrot.lane.b32.xlu0 %v1949_v48, %s2222_s20  ;;  %v1974_v48 = vld [vmem:[%s2790_s29 + $0x18] sm:$0xff] (!%p1725_p9)  }
 0x572   : > { %v1070_v50 = vpop.permute.xlu0 %1069 }
 0x573   : > { %v1072_v51 = vmul.f32 %v1070_v50, %v1066_v49  ;;  %v1975_v49 = vld [vmem:[%s2759_s8 + $0x18] sm:$0xff] (!%p1725_p9)  }
 0x575   : > { %v1074_v52 = vpack.c.bf16 %v1072_v51, %v1072_v51  ;;  %v1726_v51 = vld [vmem:[#allocation11] ss:$0 sm:$0xff] (!%p1725_p9) }
 0x577   : > { %1721 = vmatmul.mubr.msk.bf16.vlgmr.msra.gmra.mrb[12].mxu0 %vm891_vm2, %v1074_v52 }
 0x578   : > { %1767 = vmatpush3.bf16.msra.mxu0 (!%p1725_p9), %v1966_v10  ;;  %1770 = vmatprep.mubr.msk.bf16.mxu0 (!%p1725_p9), %vm2224_vm4, %v2223_v11 }
 0x579   : > { %1768 = vmatprep.subr.bf16.mxu0 (!%p1725_p9), %v2223_v11 }
 0x64a   : > { %v1112_v53 = vpop.f32.mrb[12].mxu0 }
 0x64b   : > { %v1114_v54 = vpop.f32.mrb[13].mxu0 }
 0x64c   : > { %v1121_v55 = vcombine.low %v1112_v53, %v1114_v54  ;;  %v1116_v56 = vpop.f32.mrb[14].mxu0 }
 0x64d   : > { %v1117_v57 = vpop.f32.mrb[15].mxu0 }
 0x64e   : > { %v1128_v58 = vrot.slane %v1121_v55, %v2605_v44 }
 0x650   : > { %v1130_v60 = vadd.f32 %v1128_v58, %v1073_v59 }
 0x652   : > { %1138 = vrot.lane.b32.xlu1 %v1130_v60, %s2222_s20  ;;  %v1722_v61 = vmul.f32 -1.442695, %v1130_v60 }
 0x654   : > { %1950 = vpow2.f32 %v1722_v61 }
 0x65e   : > { %v1951_v62 = vpop.eup %1950 }
 0x65f   : > { %v1134_v63 = vadd.f32 1.0, %v1951_v62  ;;  %v1976_v62 = vld [vmem:[%s2791_s15] sm:$0xff] (!%p1725_p9)  }
 0x661   : > { %1952 = vrcp.f32 %v1134_v63  ;;  %v1977_v63 = vld [vmem:[%s2791_s15 + $0x8] sm:$0xff] (!%p1725_p9)  }
 0x66b   : > { %v1953_v2 = vpop.eup %1952 }
 0x66c   : > { %v1143_v14 = vmul.f32 %v1953_v2, %v1063_v47  ;;  %v1152_v19 = vrot.slane %v1953_v2, 2  ;;  %v1972_v47 = vld [vmem:[%s2790_s29 + $0x10] sm:$0xff] (!%p1725_p9)  }
 0x6c4   : > { %v1139_v0 = vpop.permute.xlu1 %1138 }
 0x6c5   : > { %v1140_v1 = vrot.slane %v1139_v0, 2 }
 0x6c7   : > { %1954 = vtanh.f32 %v1140_v1  ;;  %v1740_v1 = vld [vmem:[#allocation13] ss:$0 sm:$0xff] (!%p1725_p9) }
 0x6d1   : > { %v1955_v4 = vpop.eup %1954 }
 0x6d2   : > { %v1144_v6 = vmul.f32 %v1955_v4, %v1953_v2 }
 0x6d4   : > { %1146 = vrot.lane.b32.xlu0 %v1144_v6, %s2222_s20 }
 0x746   : > { %v1147_v15 = vpop.permute.xlu0 %1146 }
 0x747   : > { %v1149_v16 = vadd.f32 %v1147_v15, %v1143_v14 }
 0x749   : > { %1956 = vtanh.f32 %v1149_v16 }
 0x753   : > { %v1957_v17 = vpop.eup %1956 }
 0x754   : > { %1155 = vrot.lane.b32.xlu1 %v1957_v17, %s2222_s20 }
 0x7c6   : > { %v1156_v5 = vpop.permute.xlu1 %1155 }
 0x7c7   : > { %v1158_v21 = vmul.f32 %v1156_v5, %v1152_v19  ;;  %v1741_v19 = vld [vmem:[%s2792_s16] ss:$0 sm:$0xff] (!%p1725_p9) }
 0x7c9   : > { %v1160_v22 = vpack.c.bf16 %v1158_v21, %v1158_v21 }
 0x7cb   : > { %1723 = vmatmul.mubr.msk.bf16.vlgmr.msra.gmra.mrb[12].mxu1 %vm891_vm2, %v1160_v22 }
 0x7cc   : > { %1782 = vmatprep.mubr.msk.bf16.mxu1 (!%p1725_p9), %vm2224_vm4, %v2223_v11  ;;  %1775 = vmatpush3.bf16.msra.mxu1 (!%p1725_p9), %v1969_v12 }
 0x7cd   : > { %1776 = vmatprep.subr.bf16.mxu1 (!%p1725_p9), %v2223_v11 }
 0x7d0   : > { %1777 = vmatpush3.bf16.msra.mxu1 (!%p1725_p9), %v1971_v43 }
 0x7d1   : > { %1778 = vmatprep.subr.bf16.mxu1 (!%p1725_p9), %v2223_v11 }
 0x7d4   : > { %1779 = vmatpush3.bf16.msra.mxu1 (!%p1725_p9), %v1973_v46 }
 0x7d5   : > { %1780 = vmatprep.subr.bf16.mxu1 (!%p1725_p9), %v2223_v11 }
 0x7d8   : > { %1781 = vmatpush3.bf16.msra.mxu1 (!%p1725_p9), %v1975_v49 }
 0x7d9   : > { %1798 = vmatprep.subr.bf16.mxu1 (!%p1725_p9), %v2223_v11 }
 0x89e   : > { %v1198_v23 = vpop.f32.mrb[12].mxu1 }
 0x89f   : > { %v1200_v24 = vpop.f32.mrb[13].mxu1 }
 0x8a0   : > { %v1207_v25 = vcombine.low %v1198_v23, %v1200_v24  ;;  %v1202_v26 = vpop.f32.mrb[14].mxu1 }
 0x8a1   : > { %v1203_v27 = vpop.f32.mrb[15].mxu1 }
 0x8a2   : > { %v1214_v28 = vrot.slane %v1207_v25, %v2605_v44 }
 0x8a4   : > { %v1216_v30 = vadd.f32 %v1214_v28, %v1159_v29 }
 0x8a6   : > { %1224 = vrot.lane.b32.xlu0 %v1216_v30, %s2222_s20  ;;  %v1724_v31 = vmul.f32 -1.442695, %v1216_v30 }
 0x8a8   : > { %1958 = vpow2.f32 %v1724_v31 }
 0x8b2   : > { %v1959_v32 = vpop.eup %1958 }
 0x8b3   : > { %v1220_v33 = vadd.f32 1.0, %v1959_v32 }
 0x8b5   : > { %1960 = vrcp.f32 %v1220_v33 }
 0x8bf   : > { %v1961_v36 = vpop.eup %1960 }
 0x8c0   : > { %v1229_v20 = vmul.f32 %v1961_v36, %v1149_v16  ;;  %v1238_v41 = vrot.slane %v1961_v36, 2 }
 0x918   : > { %v1225_v34 = vpop.permute.xlu0 %1224 }
 0x919   : > { %v1226_v35 = vrot.slane %v1225_v34, 2 }
 0x91b   : > { %1962 = vtanh.f32 %v1226_v35 }
 0x925   : > { %v1963_v37 = vpop.eup %1962 }
 0x926   : > { %v1230_v18 = vmul.f32 %v1963_v37, %v1961_v36 }
 0x928   : > { %1232 = vrot.lane.b32.xlu1 %v1230_v18, %s2222_s20 }
 0x99a   : > { %v1233_v38 = vpop.permute.xlu1 %1232 }
 0x99b   : > { %v1235_v39 = vadd.f32 %v1233_v38, %v1229_v20 }
 0x99d   : > { %1964 = vtanh.f32 %v1235_v39  ;;  %v1254_v40 = vrot.slane %v1235_v39, %v2605_v44  ;;  %v1967_v44 = vld [vmem:[#allocation10 + $0x8] sm:$0xff] (!%p1725_p9)  }
 0x99e   : > { %1769 = vmatpush3.bf16.msra.mxu0 (!%p1725_p9), %v1967_v44 }
 0x99f   : > { %1255 = vrot.lane.b32.xlu1 %v1254_v40, %s2222_s20  ;;  %1786 = vmatprep.subr.bf16.mxu0 (!%p1725_p9), %v2223_v11 }
 0x9a1   : > { %1771 = vmatmul.mubr.msk.bf16.vlgmr.msra.gmra.mrb[0].mxu0 (!%p1725_p9), %vm1287_vm5, %v1263_v42 }
 0x9a2   : > { %1787 = vmatpush3.bf16.msra.mxu0 (!%p1725_p9), %v1968_v13  ;;  %1794 = vmatprep.mubr.msk.bf16.mxu0 (!%p1725_p9), %vm2224_vm4, %v2223_v11 }
 0x9a3   : > { %1788 = vmatprep.subr.bf16.mxu0 (!%p1725_p9), %v2223_v11 }
 0x9a6   : > { %1789 = vmatpush3.bf16.msra.mxu0 (!%p1725_p9), %v1970_v45 }
 0x9a7   : > { %v1965_v7 = vpop.eup %1964  ;;  %1790 = vmatprep.subr.bf16.mxu0 (!%p1725_p9), %v2223_v11 }
 0x9a8   : > { %1241 = vrot.lane.b32.xlu0 %v1965_v7, %s2222_s20 }
 0x9aa   : > { %1791 = vmatpush3.bf16.msra.mxu0 (!%p1725_p9), %v1972_v47 }
 0x9ab   : > { %1792 = vmatprep.subr.bf16.mxu0 (!%p1725_p9), %v2223_v11 }
 0x9ae   : > { %1793 = vmatpush3.bf16.msra.mxu0 (!%p1725_p9), %v1974_v48 }
 0xa11   : > { %v1256_v3 = vpop.permute.xlu1 %1255 }
 0xa12   : > { %1258 = vst.msk [vmem:[#allocation4] sm:$0x3] %vm1245_vm3, %v1256_v3 }
 0xa17   : > { %1262 = sbr.rel (%p1725_p9) target bundleno = 3116 (0xc2c), region = 96 }
 0xa1a   : > { %v1242_v8 = vpop.permute.xlu0 %1241 }
 0xa1b   : > { %v1244_v9 = vmul.f32 %v1242_v8, %v1238_v41 }
 0xa1d   : > { %1246 = vst.msk [vmem:[#allocation3] sm:$0x3] %vm1245_vm3, %v1244_v9  ;;  %v1331_v50 = vpack.c.bf16 (!%p1725_p9), %v1244_v9, %v1244_v9 }
 0xa1f   : > { %1795 = vmatmul.mubr.msk.bf16.vlgmr.msra.gmra.mrb[4].mxu0 %vm891_vm2, %v1331_v50 }
 0xa74   : > { %v1325_v52 = vpop.f32.mrb[0].mxu0 }
 0xa75   : > { %v1326_v53 = vadd.f32 %v1726_v51, %v1325_v52  ;;  %v1772_v54 = vpop.f32.mrb[1].mxu0 }
 0xa76   : > { %v1328_v55 = vpop.f32.mrb[2].mxu0 }
 0xa77   : > { %v1340_v56 = vpack.c.bf16 %v1326_v53, %v1326_v53  ;;  %v1773_v57 = vpop.f32.mrb[3].mxu0 }
 0xa79   : > { %1783 = vmatmul.mubr.msk.bf16.vlgmr.msra.gmra.mrb[0].mxu1 %vm891_vm2, %v1340_v56 }
 0xa7a   : > { %1802 = vmatprep.mubr.msk.bf16.mxu1 %vm2224_vm4, %v2223_v11  ;;  %1799 = vmatpush3.bf16.msra.mxu1 %v1976_v62 }
 0xa7b   : > { %1800 = vmatprep.subr.bf16.mxu1 %v2223_v11 }
 0xa7e   : > { %1801 = vmatpush3.bf16.msra.mxu1 %v1977_v63 }
 0xaf2   : > { %v1477_v58 = vpop.f32.mrb[4].mxu0 }
 0xaf3   : > { %v1796_v59 = vpop.f32.mrb[5].mxu0 }
 0xaf4   : > { %v1480_v60 = vpop.f32.mrb[6].mxu0 }
 0xaf5   : > { %v1797_v61 = vpop.f32.mrb[7].mxu0 }
 0xb4c   : > { %v1410_v0 = vpop.f32.mrb[0].mxu1 }
 0xb4d   : > { %v1478_v2 = vadd.f32 %v1477_v58, %v1410_v0  ;;  %v1784_v4 = vpop.f32.mrb[1].mxu1 }
 0xb4e   : > { %v1413_v6 = vpop.f32.mrb[2].mxu1 }
 0xb4f   : > { %v1490_v14 = vadd.f32 %v1740_v1, %v1478_v2  ;;  %v1785_v15 = vpop.f32.mrb[3].mxu1 }
 0xb51   : > { %v1491_v16 = vmax.f32 %v1490_v14, 0.0 }
 0xb53   : > { %v1492_v17 = vpack.c.bf16 %v1491_v16, %v1491_v16 }
 0xb55   : > { %1803 = vmatmul.mubr.msk.bf16.vlgmr.msra.gmra.mrb[4].mxu1 %vm1287_vm5, %v1492_v17 }
 0xc28   : > { %v1553_v5 = vpop.f32.mrb[4].mxu1 }
 0xc29   : > { %v1554_v21 = vadd.f32 %v1741_v19, %v1553_v5  ;;  %v1804_v22 = vpop.f32.mrb[5].mxu1 }
 0xc2a   : > { %v1556_v23 = vpop.f32.mrb[6].mxu1 }
 0xc2b   : > { %1559 = vst [vmem:[#allocation14] sm:$0x3] %v1554_v21  ;;  %v1805_v24 = vpop.f32.mrb[7].mxu1 }
 0xc2c PF: > { %s2793_s28 = sadd.s32 4294967295, %s2208_s26   ;;  %s2225_s7 = smov [#allocation14]  }
 0xc2d   : > { %p2707_p8 = scmp.eq.s32.totalorder %s2793_s28, 1  ;;  %s1569_s17 = sshll.u32 %s2225_s7, 4  ;;  %s1570_s17 = int_to_ptr.vmem [resolvable:$true] %s1569_s17 }
 0xc2e   : > { %s2120_s20 = scalar_lea.vmem %s1570_s17, 32  ;;  %p2127_p5 = scmp.lt.s32.totalorder %s1570_s17, %s1570_s17 }
 0xc2f   : > { %p2121_p10 = scmp.ne.s32.totalorder %s1570_s17, %s2120_s20  ;;  %p2128_p11 = scmp.lt.s32.totalorder %s2120_s20, %s2120_s20 }
 0xc31   : > { %p2122_p1 = pnand %p2121_p10, %p2707_p8  ;;  %p2129_p13 = por %p2128_p11, %p2127_p5 }
 0xc33   : > { %p2123_p4 = pneg %p2122_p1 }
 0xc35   : > { %p2130_p2 = pnand %p2129_p13, %p2123_p4 }
 0xc37   : > { %2133 = shalt.err (!%p2130_p2)
}
 0xc38   : > { %s2795_s14 = sld [smem:[#allocation24_spill]] }
 0xc3e   : > { %s2134_s10 = scalar_lea.hbm %s2795_s14, 32 }
 0xc3f   : > { %p2135_p3 = scmp.ne.s32.totalorder %s2795_s14, %s2134_s10  ;;  %p2140_p6 = scmp.lt.u32.totalorder %s2134_s10, %s2795_s14 }
 0xc41   : > { %p2136_p12 = pnand %p2135_p3, %p2707_p8 }
 0xc43   : > { %p2137_p0 = pneg %p2136_p12 }
 0xc45   : > { %p2142_p7 = pnand %p2140_p6, %p2137_p0 }
 0xc47   : > { %2145 = shalt.err (!%p2142_p7)
}
 0xc48   : > { %1825 = dma.vmem_to_hbm [thread:$0]  (%p2707_p8), %s1570_s17, 32, %s2795_s14, [#allocation7]  }
 0xc49   : > { %2183 = dma.done.wait (%p2707_p8), [#allocation7], 32  }
 0xc4a   : > { %2185 = vsyncadd (%p2707_p8), [#allocation7], 4294967264 }
 0xc4b PF: > { %s28_s26 = sadd.s32 1, %s2208_s26   ;;  %s2796_s21 = smov %s2192_s22 }
 0xc4c   : > { %p25_p9 = scmp.ge.s32.totalorder %s28_s26, 4   ;;  %s2797_s22 = smov %s2196_s23 }
 0xc4d   : > { %s2798_s23 = smov %s2453_s18  ;;  %s2799_s24 = smov %s2204_s25 }
 0xc4e   : > { %s2800_s25 = smov %s2802_s1  ;;  %27 = sbr.rel (!%p25_p9) target bundleno = 14 (0xe), region = 137 }
 0xc55   :  { %1582 = vsyncpa [#allocation6], 1 }
 0xc56   :  { %1584 = vsyncpa [#allocation6 + $0x1], 1 }
 0xc57   :  { %1585 = vsyncpa [#allocation9], 1 }
 0xc58   :  { %1586 = vsyncpa [#allocation12], 1 }
 0xc59   :  { %1587 = vsyncpa [#allocation7], 1 }
 0xc5a   :  { %1589 = vsyncpa [#allocation7 + $0x1], 1 }

</bundles_post_ra>
